<compile_context>
chip_gen: v7x
topology: tpu7x:2x2x1
jax: 0.10.0
libtpu: 0.0.40
codegen_flags: <defaults>
</compile_context>

<pallas_src>
import jax
import jax.numpy as jnp
from jax import lax
from jax.experimental import pallas as pl
from jax.experimental.pallas import tpu as pltpu

# ----------------------------- configuration --------------------------------
EMB_DIM = 32          # embedding_dim
CLASS_NUM = 16
REL_NUM = 8
BATCH = 8             # per-axiom batch (stands in for the sampled 1024)
MARGIN = 0.0
NEG_DIST = 1.0
REG_FACTOR = 0.1
NUM_NEG = 1

D = EMB_DIM
B = BATCH
NUM_TABLES = CLASS_NUM + REL_NUM          # stacked class+relation table rows

# class-gather term order (13 terms of B rows each, first part of the stacked gather)
_C_NF1_C, _C_NF1_D = 0, 1
_C_NF2_C, _C_NF2_D, _C_NF2_E = 2, 3, 4
_C_NF3_C, _C_NF3_D = 5, 6
_C_NF4_C, _C_NF4_D = 7, 8
_C_DJ_C, _C_DJ_D = 9, 10
_C_NEG_C, _C_NEG_D = 11, 12
N_CGATHER = 13

# relation-gather term order (8 terms), appended after the class terms
_R_NF3, _R_NF4, _R_NEG = 0, 1, 2
_R_RI_R, _R_RI_S = 3, 4
_R_RC_R, _R_RC_S, _R_RC_T = 5, 6, 7
N_RGATHER = 8

NC_ROWS = N_CGATHER * B                   # 104 class-gather rows
NR_ROWS = N_RGATHER * B                   # 64  relation-gather rows
N_GROWS = NC_ROWS + NR_ROWS               # 168 total gathered rows

# packed-output row assignment (one loss term per lane-dense 128-lane output row)
TERM_NF1, TERM_NF2, TERM_NF3, TERM_NF4 = 0, 1, 2, 3
TERM_DISJOINT, TERM_NEG, TERM_RI, TERM_RC = 4, 5, 6, 7
TERM_REG, TERM_VIS, TERM_TOTAL = 8, 9, 10
N_TERMS = 11
OUT_ROWS, OUT_LANES = 16, 128


# ----------------------------- in-kernel helpers -----------------------------
def _relu(x):
    return jnp.maximum(x, 0.0)


def _l2_rows(x):
    # torch.linalg.norm(x, axis=1) reshaped to (rows, 1)
    return jnp.sqrt(jnp.sum(x * x, axis=1, keepdims=True))


def _mean11(x):
    # mean over all elements, kept as a (1, 1) array (no rank-0 values in-kernel)
    s = jnp.sum(jnp.sum(x, axis=1, keepdims=True), axis=0, keepdims=True)
    return s * (1.0 / float(x.shape[0] * x.shape[1]))


# ----------------------------- fused Pallas kernel ----------------------------
def transbox_fused_kernel(cen_tab_ref, off_tab_ref, idx_ref, out_ref):
    cen_tab = cen_tab_ref[...]                   # (NUM_TABLES, D) stacked centers
    off_tab = jnp.abs(off_tab_ref[...])          # |stacked offsets| (abs once per table)
    idx = idx_ref[...]                           # (N_GROWS, 1) i32; rel ids pre-offset by CLASS_NUM

    # ---- in-kernel gather: ONE one-hot, TWO MXU dots (centers / |offsets|) ----
    oh = (idx == lax.broadcasted_iota(
        jnp.int32, (N_GROWS, NUM_TABLES), 1)).astype(jnp.float32)       # (168, 24)
    g_cen = jnp.dot(oh, cen_tab, preferred_element_type=jnp.float32)    # (168, D)
    g_off = jnp.dot(oh, off_tab, preferred_element_type=jnp.float32)    # (168, D)

    # ---- class-center regularizer for ALL 13 class terms in one batched reduce ----
    creg_all = jnp.abs(_l2_rows(g_cen[:NC_ROWS, :]) - 1.0)              # (13B, 1)

    def cterm(t):
        s = t * B
        return g_cen[s:s + B, :], g_off[s:s + B, :], creg_all[s:s + B, :]

    def rterm(t):
        s = NC_ROWS + t * B
        return g_cen[s:s + B, :], g_off[s:s + B, :]

    # ---------------- nf1 ----------------
    c1, cr, creg = cterm(_C_NF1_C)
    d1, dr, dreg = cterm(_C_NF1_D)
    rows = _l2_rows(_relu(jnp.abs(c1 - d1) + cr - dr - MARGIN)) + creg + dreg
    loss1 = _mean11(rows * rows)

    # ---------------- nf2 (num_components == 1) ----------------
    # Closed form of the (B,) + (B,1) -> (B,B) PyTorch broadcasting quirk:
    #   mean_{i,j}((a_j + s_i)^2) = mean(a^2) + 2*mean(a)*mean(s) + mean(s^2)
    c1, c2, creg = cterm(_C_NF2_C)
    d1, d2, dreg = cterm(_C_NF2_D)
    e1, e2, ereg = cterm(_C_NF2_E)
    start_all = jnp.maximum(c1 - c2, d1 - d2)
    end_all = jnp.minimum(c1 + c2, d1 + d2)
    diff = start_all - end_all
    a_col = _l2_rows(_relu(diff))                          # (B, 1)  a_j
    new_r = diff * 0.5
    cen1 = (start_all + end_all) * 0.5
    mask0 = jnp.where(start_all > end_all, 0.0, 1.0)
    mask = mask0 * jnp.min(mask0, axis=1, keepdims=True)   # num_components == 1
    dist_box = (jnp.abs(cen1 - e1) + new_r - e2) * mask
    s_col = _l2_rows(_relu(dist_box - MARGIN)) + creg + dreg + ereg     # (B, 1)  s_i
    mean_a = _mean11(a_col)
    mean_a2 = _mean11(a_col * a_col)
    mean_s = _mean11(s_col)
    mean_s2 = _mean11(s_col * s_col)
    loss2 = mean_a2 + 2.0 * mean_a * mean_s + mean_s2

    # ---------------- nf3 (enhance=True, use_bias=False) ----------------
    c1, cr, creg = cterm(_C_NF3_C)
    d1, dr, dreg = cterm(_C_NF3_D)
    r1, rr = rterm(_R_NF3)
    rows = _l2_rows(_relu(jnp.abs((c1 - d1) - r1) + (cr + dr) - rr - MARGIN)) + creg + dreg
    loss3 = _mean11(rows * rows)

    # ---------------- nf4 ----------------
    c1, cr, creg = cterm(_C_NF4_C)
    d1, dr, dreg = cterm(_C_NF4_D)
    r1, rr = rterm(_R_NF4)
    rows = _l2_rows(_relu(jnp.abs((c1 + r1) - d1) + (rr + cr) - dr - MARGIN)) + creg + dreg
    loss4 = _mean11(rows * rows)

    # ---------------- disjoint ----------------
    c1, cr, creg = cterm(_C_DJ_C)
    d1, dr, dreg = cterm(_C_DJ_D)
    rows = _l2_rows(_relu(-jnp.abs(c1 - d1) + cr + dr - MARGIN)) + creg + dreg
    dj_loss = _mean11(rows * rows)

    # ---------------- neg (NUM_NEG == 1; reference divides inside its loop) ----------------
    c1, cr, creg = cterm(_C_NEG_C)
    d1, dr, dreg = cterm(_C_NEG_D)
    r1, rr = rterm(_R_NEG)
    rows = _l2_rows(_relu(-(jnp.abs((c1 - d1) - r1) - (cr + dr) - rr) + MARGIN)) + creg + dreg
    dneg = NEG_DIST - rows
    neg_loss = _mean11(dneg * dneg) * (1.0 / NUM_NEG)

    # ---------------- role inclusion / role chain (no reg terms) ----------------
    r_o, r_t = rterm(_R_RI_R)
    s_o, s_t = rterm(_R_RI_S)
    rows = _l2_rows(_relu(jnp.abs(r_o - s_o) + r_t - s_t - MARGIN))
    ri_loss = _mean11(rows * rows)

    r_o, r_t = rterm(_R_RC_R)
    s_o, s_t = rterm(_R_RC_S)
    t_o, t_t = rterm(_R_RC_T)
    rows = _l2_rows(_relu(jnp.abs((r_o + s_o) - t_o) + r_t + s_t - t_t - MARGIN))
    rc_loss = _mean11(rows * rows)

    # ---------------- relation-offset norm regularizer (whole relation table) ----------------
    # norm(|x|) == norm(x), so the stacked |offset| table rows [CLASS_NUM:] are sufficient.
    rel_off_norm = _l2_rows(off_tab[CLASS_NUM:CLASS_NUM + REL_NUM, :])
    reg_loss = REG_FACTOR * _mean11(_relu(rel_off_norm - 1.0))

    vis_loss = jnp.zeros((1, 1), jnp.float32)     # vis_loss=False
    # TODO(synk): use_bias=True branch (bias embedding + its reg term) and vis_loss=True
    #             branch not exercised because the module defaults used here disable them.

    total = (loss1 + loss2 + dj_loss + loss3 + loss4 + neg_loss
             + vis_loss + ri_loss + rc_loss + reg_loss)

    # ---- packed output: one lane-broadcast 128-lane row store per term ----
    terms = [loss1, loss2, loss3, loss4, dj_loss, neg_loss, ri_loss, rc_loss,
             reg_loss, vis_loss, total]
    out_ref[...] = jnp.zeros((OUT_ROWS, OUT_LANES), jnp.float32)
    zero_row = jnp.zeros((1, OUT_LANES), jnp.float32)
    for k, t in enumerate(terms):
        out_ref[k:k + 1, :] = t + zero_row        # (1,1)+(1,128) lane broadcast, row store


# ----------------------------- pallas_call glue -------------------------------
def _full_spec(shape):
    nd = len(shape)
    return pl.BlockSpec(shape, lambda i, _nd=nd: (0,) * _nd)


@jax.jit
def transbox_forward(class_embeds, rel_embeds, batches):
    """Whole TransBox forward pass in one fused Pallas kernel.

    `batches` is a dict of int32 index arrays — the deterministic stand-in for the
    np.random.choice sampling inside the PyTorch forward().
    Returns (total_loss_scalar, per_term_losses_vector).
    """
    ccen, coff = class_embeds[:, :D], class_embeds[:, D:]
    rcen, roff = rel_embeds[:, :D], rel_embeds[:, D:]
    cat_cen = jnp.concatenate([ccen, rcen], axis=0)     # (NUM_TABLES, D) stacked centers
    cat_off = jnp.concatenate([coff, roff], axis=0)     # (NUM_TABLES, D) stacked offsets

    nf1, nf2, nf3 = batches["nf1"], batches["nf2"], batches["nf3"]
    nf4, dj, neg = batches["nf4"], batches["disjoint"], batches["nf3_neg0"]
    ri, rc = batches["role_inclusion"], batches["role_chain"]

    class_cols = (nf1[:, 0], nf1[:, 1],
                  nf2[:, 0], nf2[:, 1], nf2[:, 2],
                  nf3[:, 0], nf3[:, 2],
                  nf4[:, 1], nf4[:, 2],
                  dj[:, 0], dj[:, 1],
                  neg[:, 0], neg[:, 2])
    rel_cols = (nf3[:, 1], nf4[:, 0], neg[:, 1],
                ri[:, 0], ri[:, 1],
                rc[:, 0], rc[:, 1], rc[:, 2])
    cat_idx = jnp.concatenate(
        [jnp.concatenate(class_cols),
         jnp.concatenate(rel_cols) + CLASS_NUM]).astype(jnp.int32).reshape(N_GROWS, 1)
    # TODO(synk): at production batch (1024+) and realistic CLASS_NUM, replace the
    #             one-hot MXU gather + padded (N,1) index DMA with
    #             PrefetchScalarGridSpec scalar-prefetched indices + pl.Element row-DMA
    #             gather, add a leading "parallel" batch-tile grid axis (v7x: 2 TCs),
    #             and switch the loss math to a D-on-sublane / batch-on-lane layout.
    #             On v5e the DMA-gather switch pays off earliest (weakest MXU f32 path).

    inputs = (cat_cen, cat_off, cat_idx)
    out_shape = (OUT_ROWS, OUT_LANES)
    packed = pl.pallas_call(
        transbox_fused_kernel,
        grid=(1,),
        in_specs=[_full_spec(a.shape) for a in inputs],
        out_specs=_full_spec(out_shape),
        out_shape=jax.ShapeDtypeStruct(out_shape, jnp.float32),
        compiler_params=pltpu.CompilerParams(
            dimension_semantics=("arbitrary",),
            vmem_limit_bytes=32 * 1024 * 1024),     # explicit VMEM budget (v7x-safe)
    )(*inputs)
    return packed[TERM_TOTAL, 0], packed[:N_TERMS, 0]


# ----------------------------- pure-JAX reference (host) ----------------------
def _transbox_forward_ref(cE, rE, batches):
    def reg(x):
        return jnp.abs(jnp.linalg.norm(x, axis=1) - 1.0).reshape(-1, 1)

    def l2col(x):
        return jnp.linalg.norm(x, axis=1).reshape(-1, 1)

    relu = lambda x: jnp.maximum(x, 0.0)

    def split(x):
        return x[:, :D], jnp.abs(x[:, D:])

    nf1 = batches["nf1"]
    c1, cr = split(cE[nf1[:, 0]]); d1, dr = split(cE[nf1[:, 1]])
    loss1 = jnp.mean((l2col(relu(jnp.abs(c1 - d1) + cr - dr - MARGIN)) + reg(c1) + reg(d1)) ** 2)

    nf2 = batches["nf2"]
    c1, c2 = split(cE[nf2[:, 0]]); d1, d2 = split(cE[nf2[:, 1]]); e1, e2 = split(cE[nf2[:, 2]])
    startAll = jnp.maximum(c1 - c2, d1 - d2)
    endAll = jnp.minimum(c1 + c2, d1 + d2)
    dst = jnp.linalg.norm(relu(startAll - endAll), axis=1)        # (B,)
    newR = (startAll - endAll) / 2
    cen1 = (startAll + endAll) / 2
    mask0 = jnp.where(startAll > endAll, 0.0, 1.0)
    mask = mask0 * jnp.min(mask0, axis=1, keepdims=True)
    dist_box = (jnp.abs(cen1 - e1) + newR - e2) * mask
    out2 = dst + l2col(relu(dist_box - MARGIN))                   # (B,B) broadcasting quirk
    out2 = out2 + reg(c1) + reg(d1) + reg(e1)
    loss2 = jnp.mean(out2 ** 2)

    nf3 = batches["nf3"]
    c1, cr = split(cE[nf3[:, 0]]); d1, dr = split(cE[nf3[:, 2]])
    r = rE[nf3[:, 1]]; r1, rr = r[:, :D], jnp.abs(r[:, D:])
    loss3 = jnp.mean((l2col(relu(jnp.abs((c1 - d1) - r1) + (cr + dr) - rr - MARGIN))
                      + reg(c1) + reg(d1)) ** 2)

    nf4 = batches["nf4"]
    c1, cr = split(cE[nf4[:, 1]]); d1, dr = split(cE[nf4[:, 2]])
    r = rE[nf4[:, 0]]; r1, rr = r[:, :D], jnp.abs(r[:, D:])
    loss4 = jnp.mean((l2col(relu(jnp.abs((c1 + r1) - d1) + (rr + cr) - dr - MARGIN))
                      + reg(c1) + reg(d1)) ** 2)

    dj = batches["disjoint"]
    c1, cr = split(cE[dj[:, 0]]); d1, dr = split(cE[dj[:, 1]])
    dj_loss = jnp.mean((l2col(relu(-jnp.abs(c1 - d1) + cr + dr - MARGIN)) + reg(c1) + reg(d1)) ** 2)

    neg_loss = 0.0
    for i in range(NUM_NEG):
        ng = batches[f"nf3_neg{i}"]
        c1, cr = split(cE[ng[:, 0]]); d1, dr = split(cE[ng[:, 2]])
        r = rE[ng[:, 1]]; r1, rr = r[:, :D], jnp.abs(r[:, D:])
        rows = (l2col(relu(-(jnp.abs((c1 - d1) - r1) - (cr + dr) - rr) + MARGIN))
                + reg(c1) + reg(d1))
        neg_loss = neg_loss + jnp.mean((NEG_DIST - rows) ** 2)
        neg_loss = neg_loss / NUM_NEG

    ri = batches["role_inclusion"]
    r = rE[ri[:, 0]]; s = rE[ri[:, 1]]
    ri_loss = jnp.mean(l2col(relu(jnp.abs(r[:, :D] - s[:, :D])
                                  + jnp.abs(r[:, D:]) - jnp.abs(s[:, D:]) - MARGIN)) ** 2)

    rc = batches["role_chain"]
    r = rE[rc[:, 0]]; s = rE[rc[:, 1]]; t = rE[rc[:, 2]]
    rc_loss = jnp.mean(l2col(relu(jnp.abs((r[:, :D] + s[:, :D]) - t[:, :D])
                                  + jnp.abs(r[:, D:]) + jnp.abs(s[:, D:])
                                  - jnp.abs(t[:, D:]) - MARGIN)) ** 2)

    reg_loss = REG_FACTOR * jnp.mean(relu(jnp.linalg.norm(rE[:, D:], axis=1) - 1.0))

    return loss1 + loss2 + dj_loss + loss3 + loss4 + neg_loss + 0.0 + ri_loss + rc_loss + reg_loss


# ----------------------------- main -------------------------------------------
def _row_normalize(w):
    return w / jnp.linalg.norm(w, axis=1, keepdims=True)


if __name__ == "__main__":
    key = jax.random.PRNGKey(0)
    kc, kr, ki = jax.random.split(key, 3)

    # Parameter init: uniform(-1, 1) then L2 row-normalize (as in __init__).
    class_embeds = _row_normalize(
        jax.random.uniform(kc, (CLASS_NUM, 2 * EMB_DIM), jnp.float32, -1.0, 1.0))
    rel_embeds = _row_normalize(
        jax.random.uniform(kr, (REL_NUM, 2 * EMB_DIM), jnp.float32, -1.0, 1.0))

    # Deterministic axiom batches (stand-ins for the np.random.choice sampling).
    ks = jax.random.split(ki, 16)
    cls = lambda k, shape: jax.random.randint(k, shape, 0, CLASS_NUM, dtype=jnp.int32)
    rel = lambda k, shape: jax.random.randint(k, shape, 0, REL_NUM, dtype=jnp.int32)

    batches = {
        "nf1": cls(ks[0], (BATCH, 2)),
        "nf2": cls(ks[1], (BATCH, 3)),
        "nf3": jnp.stack([cls(ks[2], (BATCH,)), rel(ks[3], (BATCH,)),
                          cls(ks[4], (BATCH,))], axis=1),
        "nf4": jnp.stack([rel(ks[5], (BATCH,)), cls(ks[6], (BATCH,)),
                          cls(ks[7], (BATCH,))], axis=1),
        "disjoint": cls(ks[8], (BATCH, 2)),
        "nf3_neg0": jnp.stack([cls(ks[9], (BATCH,)), rel(ks[10], (BATCH,)),
                               cls(ks[11], (BATCH,))], axis=1),
        "role_inclusion": rel(ks[12], (BATCH, 2)),
        "role_chain": rel(ks[13], (BATCH, 3)),
    }

    total_loss, term_losses = transbox_forward(class_embeds, rel_embeds, batches)
    total_loss = jax.block_until_ready(total_loss)
    assert jnp.isfinite(total_loss), "total loss is not finite"

    ref_total = _transbox_forward_ref(class_embeds, rel_embeds, batches)
    assert jnp.allclose(total_loss, ref_total, rtol=1e-3, atol=1e-3), (total_loss, ref_total)

    print("KERNEL_OK")
</pallas_src>

<mosaic_0001>
module attributes {stable_mosaic.version = 11 : i64} {
  func.func @transbox_fused_kernel(%arg0: i32, %arg1: memref<24x32xf32, #tpu.memory_space<vmem>>, %arg2: memref<24x32xf32, #tpu.memory_space<vmem>>, %arg3: memref<168x1xi32, #tpu.memory_space<vmem>>, %arg4: memref<16x128xf32, #tpu.memory_space<vmem>>) attributes {dimension_semantics = [#tpu.dimension_semantics<arbitrary>], iteration_bounds = array<i64: 1>, scalar_prefetch = 0 : i64, scratch_operands = 0 : i64, tpu.core_type = #tpu.core_type<tc>, window_params = [{pipeline_mode = #tpu.pipeline_mode<synchronous>, transform_indices = @transform_0, window_bounds = array<i64: 24, 32>}, {pipeline_mode = #tpu.pipeline_mode<synchronous>, transform_indices = @transform_1, window_bounds = array<i64: 24, 32>}, {pipeline_mode = #tpu.pipeline_mode<synchronous>, transform_indices = @transform_2, window_bounds = array<i64: 168, 1>}, {pipeline_mode = #tpu.pipeline_mode<synchronous>, transform_indices = @transform_3, window_bounds = array<i64: 16, 128>}]} {
    %c0 = arith.constant 0 : index
    %c0_0 = arith.constant 0 : index
    %0 = vector.load %arg1[%c0, %c0_0] : memref<24x32xf32, #tpu.memory_space<vmem>>, vector<24x32xf32>
    %c0_1 = arith.constant 0 : index
    %c0_2 = arith.constant 0 : index
    %1 = vector.load %arg2[%c0_1, %c0_2] : memref<24x32xf32, #tpu.memory_space<vmem>>, vector<24x32xf32>
    %2 = math.absf %1 : vector<24x32xf32>
    %c0_3 = arith.constant 0 : index
    %c0_4 = arith.constant 0 : index
    %3 = vector.load %arg3[%c0_3, %c0_4] : memref<168x1xi32, #tpu.memory_space<vmem>>, vector<168x1xi32>
    %4 = tpu.iota {dimensions = array<i32: 1>} : vector<168x24xi32>
    %5 = vector.broadcast %3 : vector<168x1xi32> to vector<168x24xi32>
    %6 = arith.cmpi eq, %5, %4 : vector<168x24xi32>
    %7 = arith.extui %6 : vector<168x24xi1> to vector<168x24xi32>
    %8 = arith.sitofp %7 : vector<168x24xi32> to vector<168x24xf32>
    %cst = arith.constant dense<0.000000e+00> : vector<168x32xf32>
    %9 = tpu.matmul %8, %0, %cst {dimension_numbers = #tpu.dot_dimension_numbers<[1], [0], [0], [1], [0, 0, 1, 1], [], []>} : vector<168x24xf32>, vector<24x32xf32>, vector<168x32xf32> -> vector<168x32xf32>
    %cst_5 = arith.constant dense<0.000000e+00> : vector<168x32xf32>
    %10 = tpu.matmul %8, %2, %cst_5 {dimension_numbers = #tpu.dot_dimension_numbers<[1], [0], [0], [1], [0, 0, 1, 1], [], []>} : vector<168x24xf32>, vector<24x32xf32>, vector<168x32xf32> -> vector<168x32xf32>
    %11 = vector.extract_strided_slice %9 {offsets = [0, 0], sizes = [104, 32], strides = [1, 1]} : vector<168x32xf32> to vector<104x32xf32>
    %12 = arith.mulf %11, %11 : vector<104x32xf32>
    %cst_6 = arith.constant dense<0.000000e+00> : vector<104xf32>
    %13 = vector.multi_reduction <add>, %12, %cst_6 [1] : vector<104x32xf32> to vector<104xf32>
    %14 = vector.shape_cast %13 : vector<104xf32> to vector<104x1xf32>
    %15 = math.sqrt %14 : vector<104x1xf32>
    %cst_7 = arith.constant 1.000000e+00 : f32
    %16 = vector.broadcast %cst_7 : f32 to vector<104x1xf32>
    %17 = arith.subf %15, %16 : vector<104x1xf32>
    %18 = math.absf %17 : vector<104x1xf32>
    %19 = vector.extract_strided_slice %9 {offsets = [0, 0], sizes = [8, 32], strides = [1, 1]} : vector<168x32xf32> to vector<8x32xf32>
    %20 = vector.extract_strided_slice %10 {offsets = [0, 0], sizes = [8, 32], strides = [1, 1]} : vector<168x32xf32> to vector<8x32xf32>
    %21 = vector.extract_strided_slice %18 {offsets = [0, 0], sizes = [8, 1], strides = [1, 1]} : vector<104x1xf32> to vector<8x1xf32>
    %22 = vector.extract_strided_slice %9 {offsets = [8, 0], sizes = [8, 32], strides = [1, 1]} : vector<168x32xf32> to vector<8x32xf32>
    %23 = vector.extract_strided_slice %10 {offsets = [8, 0], sizes = [8, 32], strides = [1, 1]} : vector<168x32xf32> to vector<8x32xf32>
    %24 = vector.extract_strided_slice %18 {offsets = [8, 0], sizes = [8, 1], strides = [1, 1]} : vector<104x1xf32> to vector<8x1xf32>
    %25 = arith.subf %19, %22 : vector<8x32xf32>
    %26 = math.absf %25 : vector<8x32xf32>
    %27 = arith.addf %26, %20 : vector<8x32xf32>
    %28 = arith.subf %27, %23 : vector<8x32xf32>
    %cst_8 = arith.constant 0.000000e+00 : f32
    %29 = vector.broadcast %cst_8 : f32 to vector<8x32xf32>
    %30 = arith.subf %28, %29 : vector<8x32xf32>
    %cst_9 = arith.constant 0.000000e+00 : f32
    %31 = vector.broadcast %cst_9 : f32 to vector<8x32xf32>
    %32 = arith.maximumf %30, %31 : vector<8x32xf32>
    %33 = arith.mulf %32, %32 : vector<8x32xf32>
    %cst_10 = arith.constant dense<0.000000e+00> : vector<8xf32>
    %34 = vector.multi_reduction <add>, %33, %cst_10 [1] : vector<8x32xf32> to vector<8xf32>
    %35 = vector.shape_cast %34 : vector<8xf32> to vector<8x1xf32>
    %36 = math.sqrt %35 : vector<8x1xf32>
    %37 = arith.addf %36, %21 : vector<8x1xf32>
    %38 = arith.addf %37, %24 : vector<8x1xf32>
    %39 = arith.mulf %38, %38 : vector<8x1xf32>
    %cst_11 = arith.constant dense<0.000000e+00> : vector<8xf32>
    %40 = vector.multi_reduction <add>, %39, %cst_11 [1] : vector<8x1xf32> to vector<8xf32>
    %41 = vector.shape_cast %40 : vector<8xf32> to vector<8x1xf32>
    %cst_12 = arith.constant dense<0.000000e+00> : vector<1xf32>
    %42 = vector.multi_reduction <add>, %41, %cst_12 [0] : vector<8x1xf32> to vector<1xf32>
    %43 = vector.shape_cast %42 : vector<1xf32> to vector<1x1xf32>
    %cst_13 = arith.constant 1.250000e-01 : f32
    %44 = vector.broadcast %cst_13 : f32 to vector<1x1xf32>
    %45 = arith.mulf %43, %44 : vector<1x1xf32>
    %46 = vector.extract_strided_slice %9 {offsets = [16, 0], sizes = [8, 32], strides = [1, 1]} : vector<168x32xf32> to vector<8x32xf32>
    %47 = vector.extract_strided_slice %10 {offsets = [16, 0], sizes = [8, 32], strides = [1, 1]} : vector<168x32xf32> to vector<8x32xf32>
    %48 = vector.extract_strided_slice %18 {offsets = [16, 0], sizes = [8, 1], strides = [1, 1]} : vector<104x1xf32> to vector<8x1xf32>
    %49 = vector.extract_strided_slice %9 {offsets = [24, 0], sizes = [8, 32], strides = [1, 1]} : vector<168x32xf32> to vector<8x32xf32>
    %50 = vector.extract_strided_slice %10 {offsets = [24, 0], sizes = [8, 32], strides = [1, 1]} : vector<168x32xf32> to vector<8x32xf32>
    %51 = vector.extract_strided_slice %18 {offsets = [24, 0], sizes = [8, 1], strides = [1, 1]} : vector<104x1xf32> to vector<8x1xf32>
    %52 = vector.extract_strided_slice %9 {offsets = [32, 0], sizes = [8, 32], strides = [1, 1]} : vector<168x32xf32> to vector<8x32xf32>
    %53 = vector.extract_strided_slice %10 {offsets = [32, 0], sizes = [8, 32], strides = [1, 1]} : vector<168x32xf32> to vector<8x32xf32>
    %54 = vector.extract_strided_slice %18 {offsets = [32, 0], sizes = [8, 1], strides = [1, 1]} : vector<104x1xf32> to vector<8x1xf32>
    %55 = arith.subf %46, %47 : vector<8x32xf32>
    %56 = arith.subf %49, %50 : vector<8x32xf32>
    %57 = arith.maximumf %55, %56 : vector<8x32xf32>
    %58 = arith.addf %46, %47 : vector<8x32xf32>
    %59 = arith.addf %49, %50 : vector<8x32xf32>
    %60 = arith.minimumf %58, %59 : vector<8x32xf32>
    %61 = arith.subf %57, %60 : vector<8x32xf32>
    %cst_14 = arith.constant 0.000000e+00 : f32
    %62 = vector.broadcast %cst_14 : f32 to vector<8x32xf32>
    %63 = arith.maximumf %61, %62 : vector<8x32xf32>
    %64 = arith.mulf %63, %63 : vector<8x32xf32>
    %cst_15 = arith.constant dense<0.000000e+00> : vector<8xf32>
    %65 = vector.multi_reduction <add>, %64, %cst_15 [1] : vector<8x32xf32> to vector<8xf32>
    %66 = vector.shape_cast %65 : vector<8xf32> to vector<8x1xf32>
    %67 = math.sqrt %66 : vector<8x1xf32>
    %cst_16 = arith.constant 5.000000e-01 : f32
    %68 = vector.broadcast %cst_16 : f32 to vector<8x32xf32>
    %69 = arith.mulf %61, %68 : vector<8x32xf32>
    %70 = arith.addf %57, %60 : vector<8x32xf32>
    %cst_17 = arith.constant 5.000000e-01 : f32
    %71 = vector.broadcast %cst_17 : f32 to vector<8x32xf32>
    %72 = arith.mulf %70, %71 : vector<8x32xf32>
    %73 = arith.cmpf ogt, %57, %60 : vector<8x32xf32>
    %cst_18 = arith.constant 0.000000e+00 : f32
    %cst_19 = arith.constant 1.000000e+00 : f32
    %74 = vector.broadcast %cst_18 : f32 to vector<8x32xf32>
    %75 = vector.broadcast %cst_19 : f32 to vector<8x32xf32>
    %76 = arith.select %73, %74, %75 : vector<8x32xi1>, vector<8x32xf32>
    %cst_20 = arith.constant dense<0x7F800000> : vector<8xf32>
    %77 = vector.multi_reduction <minimumf>, %76, %cst_20 [1] : vector<8x32xf32> to vector<8xf32>
    %78 = vector.shape_cast %77 : vector<8xf32> to vector<8x1xf32>
    %79 = vector.broadcast %78 : vector<8x1xf32> to vector<8x32xf32>
    %80 = arith.mulf %76, %79 : vector<8x32xf32>
    %81 = arith.subf %72, %52 : vector<8x32xf32>
    %82 = math.absf %81 : vector<8x32xf32>
    %83 = arith.addf %82, %69 : vector<8x32xf32>
    %84 = arith.subf %83, %53 : vector<8x32xf32>
    %85 = arith.mulf %84, %80 : vector<8x32xf32>
    %cst_21 = arith.constant 0.000000e+00 : f32
    %86 = vector.broadcast %cst_21 : f32 to vector<8x32xf32>
    %87 = arith.subf %85, %86 : vector<8x32xf32>
    %cst_22 = arith.constant 0.000000e+00 : f32
    %88 = vector.broadcast %cst_22 : f32 to vector<8x32xf32>
    %89 = arith.maximumf %87, %88 : vector<8x32xf32>
    %90 = arith.mulf %89, %89 : vector<8x32xf32>
    %cst_23 = arith.constant dense<0.000000e+00> : vector<8xf32>
    %91 = vector.multi_reduction <add>, %90, %cst_23 [1] : vector<8x32xf32> to vector<8xf32>
    %92 = vector.shape_cast %91 : vector<8xf32> to vector<8x1xf32>
    %93 = math.sqrt %92 : vector<8x1xf32>
    %94 = arith.addf %93, %48 : vector<8x1xf32>
    %95 = arith.addf %94, %51 : vector<8x1xf32>
    %96 = arith.addf %95, %54 : vector<8x1xf32>
    %cst_24 = arith.constant dense<0.000000e+00> : vector<8xf32>
    %97 = vector.multi_reduction <add>, %67, %cst_24 [1] : vector<8x1xf32> to vector<8xf32>
    %98 = vector.shape_cast %97 : vector<8xf32> to vector<8x1xf32>
    %cst_25 = arith.constant dense<0.000000e+00> : vector<1xf32>
    %99 = vector.multi_reduction <add>, %98, %cst_25 [0] : vector<8x1xf32> to vector<1xf32>
    %100 = vector.shape_cast %99 : vector<1xf32> to vector<1x1xf32>
    %cst_26 = arith.constant 1.250000e-01 : f32
    %101 = vector.broadcast %cst_26 : f32 to vector<1x1xf32>
    %102 = arith.mulf %100, %101 : vector<1x1xf32>
    %103 = arith.mulf %67, %67 : vector<8x1xf32>
    %cst_27 = arith.constant dense<0.000000e+00> : vector<8xf32>
    %104 = vector.multi_reduction <add>, %103, %cst_27 [1] : vector<8x1xf32> to vector<8xf32>
    %105 = vector.shape_cast %104 : vector<8xf32> to vector<8x1xf32>
    %cst_28 = arith.constant dense<0.000000e+00> : vector<1xf32>
    %106 = vector.multi_reduction <add>, %105, %cst_28 [0] : vector<8x1xf32> to vector<1xf32>
    %107 = vector.shape_cast %106 : vector<1xf32> to vector<1x1xf32>
    %cst_29 = arith.constant 1.250000e-01 : f32
    %108 = vector.broadcast %cst_29 : f32 to vector<1x1xf32>
    %109 = arith.mulf %107, %108 : vector<1x1xf32>
    %cst_30 = arith.constant dense<0.000000e+00> : vector<8xf32>
    %110 = vector.multi_reduction <add>, %96, %cst_30 [1] : vector<8x1xf32> to vector<8xf32>
    %111 = vector.shape_cast %110 : vector<8xf32> to vector<8x1xf32>
    %cst_31 = arith.constant dense<0.000000e+00> : vector<1xf32>
    %112 = vector.multi_reduction <add>, %111, %cst_31 [0] : vector<8x1xf32> to vector<1xf32>
    %113 = vector.shape_cast %112 : vector<1xf32> to vector<1x1xf32>
    %cst_32 = arith.constant 1.250000e-01 : f32
    %114 = vector.broadcast %cst_32 : f32 to vector<1x1xf32>
    %115 = arith.mulf %113, %114 : vector<1x1xf32>
    %116 = arith.mulf %96, %96 : vector<8x1xf32>
    %cst_33 = arith.constant dense<0.000000e+00> : vector<8xf32>
    %117 = vector.multi_reduction <add>, %116, %cst_33 [1] : vector<8x1xf32> to vector<8xf32>
    %118 = vector.shape_cast %117 : vector<8xf32> to vector<8x1xf32>
    %cst_34 = arith.constant dense<0.000000e+00> : vector<1xf32>
    %119 = vector.multi_reduction <add>, %118, %cst_34 [0] : vector<8x1xf32> to vector<1xf32>
    %120 = vector.shape_cast %119 : vector<1xf32> to vector<1x1xf32>
    %cst_35 = arith.constant 1.250000e-01 : f32
    %121 = vector.broadcast %cst_35 : f32 to vector<1x1xf32>
    %122 = arith.mulf %120, %121 : vector<1x1xf32>
    %cst_36 = arith.constant 2.000000e+00 : f32
    %123 = vector.broadcast %cst_36 : f32 to vector<1x1xf32>
    %124 = arith.mulf %123, %102 : vector<1x1xf32>
    %125 = arith.mulf %124, %115 : vector<1x1xf32>
    %126 = arith.addf %109, %125 : vector<1x1xf32>
    %127 = arith.addf %126, %122 : vector<1x1xf32>
    %128 = vector.extract_strided_slice %9 {offsets = [40, 0], sizes = [8, 32], strides = [1, 1]} : vector<168x32xf32> to vector<8x32xf32>
    %129 = vector.extract_strided_slice %10 {offsets = [40, 0], sizes = [8, 32], strides = [1, 1]} : vector<168x32xf32> to vector<8x32xf32>
    %130 = vector.extract_strided_slice %18 {offsets = [40, 0], sizes = [8, 1], strides = [1, 1]} : vector<104x1xf32> to vector<8x1xf32>
    %131 = vector.extract_strided_slice %9 {offsets = [48, 0], sizes = [8, 32], strides = [1, 1]} : vector<168x32xf32> to vector<8x32xf32>
    %132 = vector.extract_strided_slice %10 {offsets = [48, 0], sizes = [8, 32], strides = [1, 1]} : vector<168x32xf32> to vector<8x32xf32>
    %133 = vector.extract_strided_slice %18 {offsets = [48, 0], sizes = [8, 1], strides = [1, 1]} : vector<104x1xf32> to vector<8x1xf32>
    %134 = vector.extract_strided_slice %9 {offsets = [104, 0], sizes = [8, 32], strides = [1, 1]} : vector<168x32xf32> to vector<8x32xf32>
    %135 = vector.extract_strided_slice %10 {offsets = [104, 0], sizes = [8, 32], strides = [1, 1]} : vector<168x32xf32> to vector<8x32xf32>
    %136 = arith.subf %128, %131 : vector<8x32xf32>
    %137 = arith.subf %136, %134 : vector<8x32xf32>
    %138 = math.absf %137 : vector<8x32xf32>
    %139 = arith.addf %129, %132 : vector<8x32xf32>
    %140 = arith.addf %138, %139 : vector<8x32xf32>
    %141 = arith.subf %140, %135 : vector<8x32xf32>
    %cst_37 = arith.constant 0.000000e+00 : f32
    %142 = vector.broadcast %cst_37 : f32 to vector<8x32xf32>
    %143 = arith.subf %141, %142 : vector<8x32xf32>
    %cst_38 = arith.constant 0.000000e+00 : f32
    %144 = vector.broadcast %cst_38 : f32 to vector<8x32xf32>
    %145 = arith.maximumf %143, %144 : vector<8x32xf32>
    %146 = arith.mulf %145, %145 : vector<8x32xf32>
    %cst_39 = arith.constant dense<0.000000e+00> : vector<8xf32>
    %147 = vector.multi_reduction <add>, %146, %cst_39 [1] : vector<8x32xf32> to vector<8xf32>
    %148 = vector.shape_cast %147 : vector<8xf32> to vector<8x1xf32>
    %149 = math.sqrt %148 : vector<8x1xf32>
    %150 = arith.addf %149, %130 : vector<8x1xf32>
    %151 = arith.addf %150, %133 : vector<8x1xf32>
    %152 = arith.mulf %151, %151 : vector<8x1xf32>
    %cst_40 = arith.constant dense<0.000000e+00> : vector<8xf32>
    %153 = vector.multi_reduction <add>, %152, %cst_40 [1] : vector<8x1xf32> to vector<8xf32>
    %154 = vector.shape_cast %153 : vector<8xf32> to vector<8x1xf32>
    %cst_41 = arith.constant dense<0.000000e+00> : vector<1xf32>
    %155 = vector.multi_reduction <add>, %154, %cst_41 [0] : vector<8x1xf32> to vector<1xf32>
    %156 = vector.shape_cast %155 : vector<1xf32> to vector<1x1xf32>
    %cst_42 = arith.constant 1.250000e-01 : f32
    %157 = vector.broadcast %cst_42 : f32 to vector<1x1xf32>
    %158 = arith.mulf %156, %157 : vector<1x1xf32>
    %159 = vector.extract_strided_slice %9 {offsets = [56, 0], sizes = [8, 32], strides = [1, 1]} : vector<168x32xf32> to vector<8x32xf32>
    %160 = vector.extract_strided_slice %10 {offsets = [56, 0], sizes = [8, 32], strides = [1, 1]} : vector<168x32xf32> to vector<8x32xf32>
    %161 = vector.extract_strided_slice %18 {offsets = [56, 0], sizes = [8, 1], strides = [1, 1]} : vector<104x1xf32> to vector<8x1xf32>
    %162 = vector.extract_strided_slice %9 {offsets = [64, 0], sizes = [8, 32], strides = [1, 1]} : vector<168x32xf32> to vector<8x32xf32>
    %163 = vector.extract_strided_slice %10 {offsets = [64, 0], sizes = [8, 32], strides = [1, 1]} : vector<168x32xf32> to vector<8x32xf32>
    %164 = vector.extract_strided_slice %18 {offsets = [64, 0], sizes = [8, 1], strides = [1, 1]} : vector<104x1xf32> to vector<8x1xf32>
    %165 = vector.extract_strided_slice %9 {offsets = [112, 0], sizes = [8, 32], strides = [1, 1]} : vector<168x32xf32> to vector<8x32xf32>
    %166 = vector.extract_strided_slice %10 {offsets = [112, 0], sizes = [8, 32], strides = [1, 1]} : vector<168x32xf32> to vector<8x32xf32>
    %167 = arith.addf %159, %165 : vector<8x32xf32>
    %168 = arith.subf %167, %162 : vector<8x32xf32>
    %169 = math.absf %168 : vector<8x32xf32>
    %170 = arith.addf %166, %160 : vector<8x32xf32>
    %171 = arith.addf %169, %170 : vector<8x32xf32>
    %172 = arith.subf %171, %163 : vector<8x32xf32>
    %cst_43 = arith.constant 0.000000e+00 : f32
    %173 = vector.broadcast %cst_43 : f32 to vector<8x32xf32>
    %174 = arith.subf %172, %173 : vector<8x32xf32>
    %cst_44 = arith.constant 0.000000e+00 : f32
    %175 = vector.broadcast %cst_44 : f32 to vector<8x32xf32>
    %176 = arith.maximumf %174, %175 : vector<8x32xf32>
    %177 = arith.mulf %176, %176 : vector<8x32xf32>
    %cst_45 = arith.constant dense<0.000000e+00> : vector<8xf32>
    %178 = vector.multi_reduction <add>, %177, %cst_45 [1] : vector<8x32xf32> to vector<8xf32>
    %179 = vector.shape_cast %178 : vector<8xf32> to vector<8x1xf32>
    %180 = math.sqrt %179 : vector<8x1xf32>
    %181 = arith.addf %180, %161 : vector<8x1xf32>
    %182 = arith.addf %181, %164 : vector<8x1xf32>
    %183 = arith.mulf %182, %182 : vector<8x1xf32>
    %cst_46 = arith.constant dense<0.000000e+00> : vector<8xf32>
    %184 = vector.multi_reduction <add>, %183, %cst_46 [1] : vector<8x1xf32> to vector<8xf32>
    %185 = vector.shape_cast %184 : vector<8xf32> to vector<8x1xf32>
    %cst_47 = arith.constant dense<0.000000e+00> : vector<1xf32>
    %186 = vector.multi_reduction <add>, %185, %cst_47 [0] : vector<8x1xf32> to vector<1xf32>
    %187 = vector.shape_cast %186 : vector<1xf32> to vector<1x1xf32>
    %cst_48 = arith.constant 1.250000e-01 : f32
    %188 = vector.broadcast %cst_48 : f32 to vector<1x1xf32>
    %189 = arith.mulf %187, %188 : vector<1x1xf32>
    %190 = vector.extract_strided_slice %9 {offsets = [72, 0], sizes = [8, 32], strides = [1, 1]} : vector<168x32xf32> to vector<8x32xf32>
    %191 = vector.extract_strided_slice %10 {offsets = [72, 0], sizes = [8, 32], strides = [1, 1]} : vector<168x32xf32> to vector<8x32xf32>
    %192 = vector.extract_strided_slice %18 {offsets = [72, 0], sizes = [8, 1], strides = [1, 1]} : vector<104x1xf32> to vector<8x1xf32>
    %193 = vector.extract_strided_slice %9 {offsets = [80, 0], sizes = [8, 32], strides = [1, 1]} : vector<168x32xf32> to vector<8x32xf32>
    %194 = vector.extract_strided_slice %10 {offsets = [80, 0], sizes = [8, 32], strides = [1, 1]} : vector<168x32xf32> to vector<8x32xf32>
    %195 = vector.extract_strided_slice %18 {offsets = [80, 0], sizes = [8, 1], strides = [1, 1]} : vector<104x1xf32> to vector<8x1xf32>
    %196 = arith.subf %190, %193 : vector<8x32xf32>
    %197 = math.absf %196 : vector<8x32xf32>
    %cst_49 = arith.constant 0.000000e+00 : f32
    %198 = vector.broadcast %cst_49 : f32 to vector<8x32xf32>
    %199 = arith.subf %198, %197 : vector<8x32xf32>
    %200 = arith.addf %199, %191 : vector<8x32xf32>
    %201 = arith.addf %200, %194 : vector<8x32xf32>
    %cst_50 = arith.constant 0.000000e+00 : f32
    %202 = vector.broadcast %cst_50 : f32 to vector<8x32xf32>
    %203 = arith.subf %201, %202 : vector<8x32xf32>
    %cst_51 = arith.constant 0.000000e+00 : f32
    %204 = vector.broadcast %cst_51 : f32 to vector<8x32xf32>
    %205 = arith.maximumf %203, %204 : vector<8x32xf32>
    %206 = arith.mulf %205, %205 : vector<8x32xf32>
    %cst_52 = arith.constant dense<0.000000e+00> : vector<8xf32>
    %207 = vector.multi_reduction <add>, %206, %cst_52 [1] : vector<8x32xf32> to vector<8xf32>
    %208 = vector.shape_cast %207 : vector<8xf32> to vector<8x1xf32>
    %209 = math.sqrt %208 : vector<8x1xf32>
    %210 = arith.addf %209, %192 : vector<8x1xf32>
    %211 = arith.addf %210, %195 : vector<8x1xf32>
    %212 = arith.mulf %211, %211 : vector<8x1xf32>
    %cst_53 = arith.constant dense<0.000000e+00> : vector<8xf32>
    %213 = vector.multi_reduction <add>, %212, %cst_53 [1] : vector<8x1xf32> to vector<8xf32>
    %214 = vector.shape_cast %213 : vector<8xf32> to vector<8x1xf32>
    %cst_54 = arith.constant dense<0.000000e+00> : vector<1xf32>
    %215 = vector.multi_reduction <add>, %214, %cst_54 [0] : vector<8x1xf32> to vector<1xf32>
    %216 = vector.shape_cast %215 : vector<1xf32> to vector<1x1xf32>
    %cst_55 = arith.constant 1.250000e-01 : f32
    %217 = vector.broadcast %cst_55 : f32 to vector<1x1xf32>
    %218 = arith.mulf %216, %217 : vector<1x1xf32>
    %219 = vector.extract_strided_slice %9 {offsets = [88, 0], sizes = [8, 32], strides = [1, 1]} : vector<168x32xf32> to vector<8x32xf32>
    %220 = vector.extract_strided_slice %10 {offsets = [88, 0], sizes = [8, 32], strides = [1, 1]} : vector<168x32xf32> to vector<8x32xf32>
    %221 = vector.extract_strided_slice %18 {offsets = [88, 0], sizes = [8, 1], strides = [1, 1]} : vector<104x1xf32> to vector<8x1xf32>
    %222 = vector.extract_strided_slice %9 {offsets = [96, 0], sizes = [8, 32], strides = [1, 1]} : vector<168x32xf32> to vector<8x32xf32>
    %223 = vector.extract_strided_slice %10 {offsets = [96, 0], sizes = [8, 32], strides = [1, 1]} : vector<168x32xf32> to vector<8x32xf32>
    %224 = vector.extract_strided_slice %18 {offsets = [96, 0], sizes = [8, 1], strides = [1, 1]} : vector<104x1xf32> to vector<8x1xf32>
    %225 = vector.extract_strided_slice %9 {offsets = [120, 0], sizes = [8, 32], strides = [1, 1]} : vector<168x32xf32> to vector<8x32xf32>
    %226 = vector.extract_strided_slice %10 {offsets = [120, 0], sizes = [8, 32], strides = [1, 1]} : vector<168x32xf32> to vector<8x32xf32>
    %227 = arith.subf %219, %222 : vector<8x32xf32>
    %228 = arith.subf %227, %225 : vector<8x32xf32>
    %229 = math.absf %228 : vector<8x32xf32>
    %230 = arith.addf %220, %223 : vector<8x32xf32>
    %231 = arith.subf %229, %230 : vector<8x32xf32>
    %232 = arith.subf %231, %226 : vector<8x32xf32>
    %cst_56 = arith.constant 0.000000e+00 : f32
    %233 = vector.broadcast %cst_56 : f32 to vector<8x32xf32>
    %234 = arith.subf %233, %232 : vector<8x32xf32>
    %cst_57 = arith.constant 0.000000e+00 : f32
    %235 = vector.broadcast %cst_57 : f32 to vector<8x32xf32>
    %236 = arith.addf %234, %235 : vector<8x32xf32>
    %cst_58 = arith.constant 0.000000e+00 : f32
    %237 = vector.broadcast %cst_58 : f32 to vector<8x32xf32>
    %238 = arith.maximumf %236, %237 : vector<8x32xf32>
    %239 = arith.mulf %238, %238 : vector<8x32xf32>
    %cst_59 = arith.constant dense<0.000000e+00> : vector<8xf32>
    %240 = vector.multi_reduction <add>, %239, %cst_59 [1] : vector<8x32xf32> to vector<8xf32>
    %241 = vector.shape_cast %240 : vector<8xf32> to vector<8x1xf32>
    %242 = math.sqrt %241 : vector<8x1xf32>
    %243 = arith.addf %242, %221 : vector<8x1xf32>
    %244 = arith.addf %243, %224 : vector<8x1xf32>
    %cst_60 = arith.constant 1.000000e+00 : f32
    %245 = vector.broadcast %cst_60 : f32 to vector<8x1xf32>
    %246 = arith.subf %245, %244 : vector<8x1xf32>
    %247 = arith.mulf %246, %246 : vector<8x1xf32>
    %cst_61 = arith.constant dense<0.000000e+00> : vector<8xf32>
    %248 = vector.multi_reduction <add>, %247, %cst_61 [1] : vector<8x1xf32> to vector<8xf32>
    %249 = vector.shape_cast %248 : vector<8xf32> to vector<8x1xf32>
    %cst_62 = arith.constant dense<0.000000e+00> : vector<1xf32>
    %250 = vector.multi_reduction <add>, %249, %cst_62 [0] : vector<8x1xf32> to vector<1xf32>
    %251 = vector.shape_cast %250 : vector<1xf32> to vector<1x1xf32>
    %cst_63 = arith.constant 1.250000e-01 : f32
    %252 = vector.broadcast %cst_63 : f32 to vector<1x1xf32>
    %253 = arith.mulf %251, %252 : vector<1x1xf32>
    %cst_64 = arith.constant 1.000000e+00 : f32
    %254 = vector.broadcast %cst_64 : f32 to vector<1x1xf32>
    %255 = arith.mulf %253, %254 : vector<1x1xf32>
    %256 = vector.extract_strided_slice %9 {offsets = [128, 0], sizes = [8, 32], strides = [1, 1]} : vector<168x32xf32> to vector<8x32xf32>
    %257 = vector.extract_strided_slice %10 {offsets = [128, 0], sizes = [8, 32], strides = [1, 1]} : vector<168x32xf32> to vector<8x32xf32>
    %258 = vector.extract_strided_slice %9 {offsets = [136, 0], sizes = [8, 32], strides = [1, 1]} : vector<168x32xf32> to vector<8x32xf32>
    %259 = vector.extract_strided_slice %10 {offsets = [136, 0], sizes = [8, 32], strides = [1, 1]} : vector<168x32xf32> to vector<8x32xf32>
    %260 = arith.subf %256, %258 : vector<8x32xf32>
    %261 = math.absf %260 : vector<8x32xf32>
    %262 = arith.addf %261, %257 : vector<8x32xf32>
    %263 = arith.subf %262, %259 : vector<8x32xf32>
    %cst_65 = arith.constant 0.000000e+00 : f32
    %264 = vector.broadcast %cst_65 : f32 to vector<8x32xf32>
    %265 = arith.subf %263, %264 : vector<8x32xf32>
    %cst_66 = arith.constant 0.000000e+00 : f32
    %266 = vector.broadcast %cst_66 : f32 to vector<8x32xf32>
    %267 = arith.maximumf %265, %266 : vector<8x32xf32>
    %268 = arith.mulf %267, %267 : vector<8x32xf32>
    %cst_67 = arith.constant dense<0.000000e+00> : vector<8xf32>
    %269 = vector.multi_reduction <add>, %268, %cst_67 [1] : vector<8x32xf32> to vector<8xf32>
    %270 = vector.shape_cast %269 : vector<8xf32> to vector<8x1xf32>
    %271 = math.sqrt %270 : vector<8x1xf32>
    %272 = arith.mulf %271, %271 : vector<8x1xf32>
    %cst_68 = arith.constant dense<0.000000e+00> : vector<8xf32>
    %273 = vector.multi_reduction <add>, %272, %cst_68 [1] : vector<8x1xf32> to vector<8xf32>
    %274 = vector.shape_cast %273 : vector<8xf32> to vector<8x1xf32>
    %cst_69 = arith.constant dense<0.000000e+00> : vector<1xf32>
    %275 = vector.multi_reduction <add>, %274, %cst_69 [0] : vector<8x1xf32> to vector<1xf32>
    %276 = vector.shape_cast %275 : vector<1xf32> to vector<1x1xf32>
    %cst_70 = arith.constant 1.250000e-01 : f32
    %277 = vector.broadcast %cst_70 : f32 to vector<1x1xf32>
    %278 = arith.mulf %276, %277 : vector<1x1xf32>
    %279 = vector.extract_strided_slice %9 {offsets = [144, 0], sizes = [8, 32], strides = [1, 1]} : vector<168x32xf32> to vector<8x32xf32>
    %280 = vector.extract_strided_slice %10 {offsets = [144, 0], sizes = [8, 32], strides = [1, 1]} : vector<168x32xf32> to vector<8x32xf32>
    %281 = vector.extract_strided_slice %9 {offsets = [152, 0], sizes = [8, 32], strides = [1, 1]} : vector<168x32xf32> to vector<8x32xf32>
    %282 = vector.extract_strided_slice %10 {offsets = [152, 0], sizes = [8, 32], strides = [1, 1]} : vector<168x32xf32> to vector<8x32xf32>
    %283 = vector.extract_strided_slice %9 {offsets = [160, 0], sizes = [8, 32], strides = [1, 1]} : vector<168x32xf32> to vector<8x32xf32>
    %284 = vector.extract_strided_slice %10 {offsets = [160, 0], sizes = [8, 32], strides = [1, 1]} : vector<168x32xf32> to vector<8x32xf32>
    %285 = arith.addf %279, %281 : vector<8x32xf32>
    %286 = arith.subf %285, %283 : vector<8x32xf32>
    %287 = math.absf %286 : vector<8x32xf32>
    %288 = arith.addf %287, %280 : vector<8x32xf32>
    %289 = arith.addf %288, %282 : vector<8x32xf32>
    %290 = arith.subf %289, %284 : vector<8x32xf32>
    %cst_71 = arith.constant 0.000000e+00 : f32
    %291 = vector.broadcast %cst_71 : f32 to vector<8x32xf32>
    %292 = arith.subf %290, %291 : vector<8x32xf32>
    %cst_72 = arith.constant 0.000000e+00 : f32
    %293 = vector.broadcast %cst_72 : f32 to vector<8x32xf32>
    %294 = arith.maximumf %292, %293 : vector<8x32xf32>
    %295 = arith.mulf %294, %294 : vector<8x32xf32>
    %cst_73 = arith.constant dense<0.000000e+00> : vector<8xf32>
    %296 = vector.multi_reduction <add>, %295, %cst_73 [1] : vector<8x32xf32> to vector<8xf32>
    %297 = vector.shape_cast %296 : vector<8xf32> to vector<8x1xf32>
    %298 = math.sqrt %297 : vector<8x1xf32>
    %299 = arith.mulf %298, %298 : vector<8x1xf32>
    %cst_74 = arith.constant dense<0.000000e+00> : vector<8xf32>
    %300 = vector.multi_reduction <add>, %299, %cst_74 [1] : vector<8x1xf32> to vector<8xf32>
    %301 = vector.shape_cast %300 : vector<8xf32> to vector<8x1xf32>
    %cst_75 = arith.constant dense<0.000000e+00> : vector<1xf32>
    %302 = vector.multi_reduction <add>, %301, %cst_75 [0] : vector<8x1xf32> to vector<1xf32>
    %303 = vector.shape_cast %302 : vector<1xf32> to vector<1x1xf32>
    %cst_76 = arith.constant 1.250000e-01 : f32
    %304 = vector.broadcast %cst_76 : f32 to vector<1x1xf32>
    %305 = arith.mulf %303, %304 : vector<1x1xf32>
    %306 = vector.extract_strided_slice %2 {offsets = [16, 0], sizes = [8, 32], strides = [1, 1]} : vector<24x32xf32> to vector<8x32xf32>
    %307 = arith.mulf %306, %306 : vector<8x32xf32>
    %cst_77 = arith.constant dense<0.000000e+00> : vector<8xf32>
    %308 = vector.multi_reduction <add>, %307, %cst_77 [1] : vector<8x32xf32> to vector<8xf32>
    %309 = vector.shape_cast %308 : vector<8xf32> to vector<8x1xf32>
    %310 = math.sqrt %309 : vector<8x1xf32>
    %cst_78 = arith.constant 1.000000e+00 : f32
    %311 = vector.broadcast %cst_78 : f32 to vector<8x1xf32>
    %312 = arith.subf %310, %311 : vector<8x1xf32>
    %cst_79 = arith.constant 0.000000e+00 : f32
    %313 = vector.broadcast %cst_79 : f32 to vector<8x1xf32>
    %314 = arith.maximumf %312, %313 : vector<8x1xf32>
    %cst_80 = arith.constant dense<0.000000e+00> : vector<8xf32>
    %315 = vector.multi_reduction <add>, %314, %cst_80 [1] : vector<8x1xf32> to vector<8xf32>
    %316 = vector.shape_cast %315 : vector<8xf32> to vector<8x1xf32>
    %cst_81 = arith.constant dense<0.000000e+00> : vector<1xf32>
    %317 = vector.multi_reduction <add>, %316, %cst_81 [0] : vector<8x1xf32> to vector<1xf32>
    %318 = vector.shape_cast %317 : vector<1xf32> to vector<1x1xf32>
    %cst_82 = arith.constant 1.250000e-01 : f32
    %319 = vector.broadcast %cst_82 : f32 to vector<1x1xf32>
    %320 = arith.mulf %318, %319 : vector<1x1xf32>
    %cst_83 = arith.constant 1.000000e-01 : f32
    %321 = vector.broadcast %cst_83 : f32 to vector<1x1xf32>
    %322 = arith.mulf %321, %320 : vector<1x1xf32>
    %cst_84 = arith.constant 0.000000e+00 : f32
    %323 = vector.broadcast %cst_84 : f32 to vector<1x1xf32>
    %324 = arith.addf %45, %127 : vector<1x1xf32>
    %325 = arith.addf %324, %218 : vector<1x1xf32>
    %326 = arith.addf %325, %158 : vector<1x1xf32>
    %327 = arith.addf %326, %189 : vector<1x1xf32>
    %328 = arith.addf %327, %255 : vector<1x1xf32>
    %329 = arith.addf %328, %323 : vector<1x1xf32>
    %330 = arith.addf %329, %278 : vector<1x1xf32>
    %331 = arith.addf %330, %305 : vector<1x1xf32>
    %332 = arith.addf %331, %322 : vector<1x1xf32>
    %cst_85 = arith.constant 0.000000e+00 : f32
    %333 = vector.broadcast %cst_85 : f32 to vector<16x128xf32>
    %c0_86 = arith.constant 0 : index
    %c0_87 = arith.constant 0 : index
    %334 = vector.load %arg4[%c0_86, %c0_87] : memref<16x128xf32, #tpu.memory_space<vmem>>, vector<16x128xf32>
    tpu.vector_store %arg4[%c0_86, %c0_87], %333 {strides = array<i32>} : memref<16x128xf32, #tpu.memory_space<vmem>>, vector<16x128xf32>,
    %cst_88 = arith.constant 0.000000e+00 : f32
    %335 = vector.broadcast %cst_88 : f32 to vector<1x128xf32>
    %336 = vector.broadcast %45 : vector<1x1xf32> to vector<1x128xf32>
    %337 = arith.addf %336, %335 : vector<1x128xf32>
    %c0_89 = arith.constant 0 : index
    %c0_90 = arith.constant 0 : index
    %338 = vector.load %arg4[%c0_89, %c0_90] : memref<16x128xf32, #tpu.memory_space<vmem>>, vector<1x128xf32>
    tpu.vector_store %arg4[%c0_89, %c0_90], %337 {strides = array<i32>} : memref<16x128xf32, #tpu.memory_space<vmem>>, vector<1x128xf32>,
    %339 = vector.broadcast %127 : vector<1x1xf32> to vector<1x128xf32>
    %340 = arith.addf %339, %335 : vector<1x128xf32>
    %c1 = arith.constant 1 : index
    %c0_91 = arith.constant 0 : index
    %341 = vector.load %arg4[%c1, %c0_91] : memref<16x128xf32, #tpu.memory_space<vmem>>, vector<1x128xf32>
    tpu.vector_store %arg4[%c1, %c0_91], %340 {strides = array<i32>} : memref<16x128xf32, #tpu.memory_space<vmem>>, vector<1x128xf32>,
    %342 = vector.broadcast %158 : vector<1x1xf32> to vector<1x128xf32>
    %343 = arith.addf %342, %335 : vector<1x128xf32>
    %c2 = arith.constant 2 : index
    %c0_92 = arith.constant 0 : index
    %344 = vector.load %arg4[%c2, %c0_92] : memref<16x128xf32, #tpu.memory_space<vmem>>, vector<1x128xf32>
    tpu.vector_store %arg4[%c2, %c0_92], %343 {strides = array<i32>} : memref<16x128xf32, #tpu.memory_space<vmem>>, vector<1x128xf32>,
    %345 = vector.broadcast %189 : vector<1x1xf32> to vector<1x128xf32>
    %346 = arith.addf %345, %335 : vector<1x128xf32>
    %c3 = arith.constant 3 : index
    %c0_93 = arith.constant 0 : index
    %347 = vector.load %arg4[%c3, %c0_93] : memref<16x128xf32, #tpu.memory_space<vmem>>, vector<1x128xf32>
    tpu.vector_store %arg4[%c3, %c0_93], %346 {strides = array<i32>} : memref<16x128xf32, #tpu.memory_space<vmem>>, vector<1x128xf32>,
    %348 = vector.broadcast %218 : vector<1x1xf32> to vector<1x128xf32>
    %349 = arith.addf %348, %335 : vector<1x128xf32>
    %c4 = arith.constant 4 : index
    %c0_94 = arith.constant 0 : index
    %350 = vector.load %arg4[%c4, %c0_94] : memref<16x128xf32, #tpu.memory_space<vmem>>, vector<1x128xf32>
    tpu.vector_store %arg4[%c4, %c0_94], %349 {strides = array<i32>} : memref<16x128xf32, #tpu.memory_space<vmem>>, vector<1x128xf32>,
    %351 = vector.broadcast %255 : vector<1x1xf32> to vector<1x128xf32>
    %352 = arith.addf %351, %335 : vector<1x128xf32>
    %c5 = arith.constant 5 : index
    %c0_95 = arith.constant 0 : index
    %353 = vector.load %arg4[%c5, %c0_95] : memref<16x128xf32, #tpu.memory_space<vmem>>, vector<1x128xf32>
    tpu.vector_store %arg4[%c5, %c0_95], %352 {strides = array<i32>} : memref<16x128xf32, #tpu.memory_space<vmem>>, vector<1x128xf32>,
    %354 = vector.broadcast %278 : vector<1x1xf32> to vector<1x128xf32>
    %355 = arith.addf %354, %335 : vector<1x128xf32>
    %c6 = arith.constant 6 : index
    %c0_96 = arith.constant 0 : index
    %356 = vector.load %arg4[%c6, %c0_96] : memref<16x128xf32, #tpu.memory_space<vmem>>, vector<1x128xf32>
    tpu.vector_store %arg4[%c6, %c0_96], %355 {strides = array<i32>} : memref<16x128xf32, #tpu.memory_space<vmem>>, vector<1x128xf32>,
    %357 = vector.broadcast %305 : vector<1x1xf32> to vector<1x128xf32>
    %358 = arith.addf %357, %335 : vector<1x128xf32>
    %c7 = arith.constant 7 : index
    %c0_97 = arith.constant 0 : index
    %359 = vector.load %arg4[%c7, %c0_97] : memref<16x128xf32, #tpu.memory_space<vmem>>, vector<1x128xf32>
    tpu.vector_store %arg4[%c7, %c0_97], %358 {strides = array<i32>} : memref<16x128xf32, #tpu.memory_space<vmem>>, vector<1x128xf32>,
    %360 = vector.broadcast %322 : vector<1x1xf32> to vector<1x128xf32>
    %361 = arith.addf %360, %335 : vector<1x128xf32>
    %c8 = arith.constant 8 : index
    %c0_98 = arith.constant 0 : index
    %362 = vector.load %arg4[%c8, %c0_98] : memref<16x128xf32, #tpu.memory_space<vmem>>, vector<1x128xf32>
    tpu.vector_store %arg4[%c8, %c0_98], %361 {strides = array<i32>} : memref<16x128xf32, #tpu.memory_space<vmem>>, vector<1x128xf32>,
    %363 = vector.broadcast %323 : vector<1x1xf32> to vector<1x128xf32>
    %364 = arith.addf %363, %335 : vector<1x128xf32>
    %c9 = arith.constant 9 : index
    %c0_99 = arith.constant 0 : index
    %365 = vector.load %arg4[%c9, %c0_99] : memref<16x128xf32, #tpu.memory_space<vmem>>, vector<1x128xf32>
    tpu.vector_store %arg4[%c9, %c0_99], %364 {strides = array<i32>} : memref<16x128xf32, #tpu.memory_space<vmem>>, vector<1x128xf32>,
    %366 = vector.broadcast %332 : vector<1x1xf32> to vector<1x128xf32>
    %367 = arith.addf %366, %335 : vector<1x128xf32>
    %c10 = arith.constant 10 : index
    %c0_100 = arith.constant 0 : index
    %368 = vector.load %arg4[%c10, %c0_100] : memref<16x128xf32, #tpu.memory_space<vmem>>, vector<1x128xf32>
    tpu.vector_store %arg4[%c10, %c0_100], %367 {strides = array<i32>} : memref<16x128xf32, #tpu.memory_space<vmem>>, vector<1x128xf32>,
    return
  }
  func.func @transform_0(%arg0: i32) -> (i32, i32) {
    %c0_i32 = arith.constant 0 : i32
    %c0_i32_0 = arith.constant 0 : i32
    %c0_i32_1 = arith.constant 0 : i32
    return %c0_i32, %c0_i32_0 : i32, i32
  }
  func.func @transform_1(%arg0: i32) -> (i32, i32) {
    %c0_i32 = arith.constant 0 : i32
    %c0_i32_0 = arith.constant 0 : i32
    %c0_i32_1 = arith.constant 0 : i32
    return %c0_i32, %c0_i32_0 : i32, i32
  }
  func.func @transform_2(%arg0: i32) -> (i32, i32) {
    %c0_i32 = arith.constant 0 : i32
    %c0_i32_0 = arith.constant 0 : i32
    %c0_i32_1 = arith.constant 0 : i32
    return %c0_i32, %c0_i32_0 : i32, i32
  }
  func.func @transform_3(%arg0: i32) -> (i32, i32) {
    %c0_i32 = arith.constant 0 : i32
    %c0_i32_0 = arith.constant 0 : i32
    %c0_i32_1 = arith.constant 0 : i32
    return %c0_i32, %c0_i32_0 : i32, i32
  }
}

</mosaic_0001>

<bundles_post_ra>
// kernel: transbox_forward.1
= control target key start
LH: loop header
LB: loop body
LE: loop exit
PB: predicated region body
PF: predicated region fallthrough
CT: control target
= control target key end

     0   :  { %v1419_v0 = vmov 0   ;;  %v1420_v5 = vmov 0.0|0.0   ;;  %vm1421_vm0 = vmmov 0   ;;  %v1422_v6 = vmov 0.0   ;;  %s1941_s2 = inlined_call_operand.vmem [shape: s32[168,1], index: 2, kind: input, shape index: {}]   ;;  %s1942_s0 = inlined_call_operand.vmem [shape: f32[24,32], index: 0, kind: input, shape index: {}]   ;;  %s1943_s1 = inlined_call_operand.vmem [shape: f32[24,32], index: 1, kind: input, shape index: {}]   ;;  %s1944_s3 = inlined_call_operand.vmem [shape: f32[16,128], index: 3, kind: output, shape index: {}]  }
   0x1   :  { %1372 = vset.pattern.permute.xlu1 %v1419_v0  ;;  %1371 = vset.pattern.permute.xlu0 %v1419_v0  ;;  %v25_v1 = vld [vmem:[%s1941_s2 + $0x10] sm:$0xff]  ;;  %v23_v2 = vld [vmem:[%s1941_s2] sm:$0xff]  ;;  %v26_v3 = vld [vmem:[%s1941_s2 + $0x18] sm:$0xff]  ;;  %v44_v35 = vlaneseq  ;;  %vm172_vm1 = vcmask 195584   ;;  %1060 = vst [vmem:[%s1944_s3] sm:$0xff] %v1422_v6 }
   0x2   :  { %53 = vperm.xlu1 %1372, %v25_v1   ;;  %47 = vperm.xlu0 %1371, %v23_v2   ;;  %v24_v4 = vld [vmem:[%s1941_s2 + $0x8] sm:$0xff]  ;;  %v27_v8 = vld [vmem:[%s1941_s2 + $0x20] sm:$0xff]  ;;  %v30_v16 = vld [vmem:[%s1941_s2 + $0x38] sm:$0xff]  ;;  %1061 = vst [vmem:[%s1944_s3 + $0x8] sm:$0xff] %v1422_v6 }
   0x3   :  { %1350 = vmatprep.subr.bf16.mxu0 %v1420_v5  ;;  %1353 = vmatprep.subr.bf16.mxu1 %v1420_v5  ;;  %v28_v7 = vld [vmem:[%s1941_s2 + $0x28] sm:$0xff]  ;;  %v14_v9 = vld [vmem:[%s1942_s0] sm:$0xff]  ;;  %v29_v17 = vld [vmem:[%s1941_s2 + $0x30] sm:$0xff]  ;;  %v1534_v36 = vand.u32 127, %v44_v35  ;;  %1080 = vst [vmem:[%s1944_s3 + $0x9] sm:$0x1] %v1422_v6 }
   0x4   :  { %1218 = vmatprep.mubr.msk.f32.mxu0 %vm1421_vm0, %v1422_v6  ;;  %1287 = vmatprep.mubr.msk.f32.mxu1 %vm1421_vm0, %v1422_v6  ;;  %v15_v10 = vld [vmem:[%s1942_s0 + $0x8] sm:$0xff]  ;;  %v17_v11 = vld [vmem:[%s1943_s1] sm:$0xff]  ;;  %v16_v19 = vld [vmem:[%s1942_s0 + $0x10] sm:$0xff] }
   0x5   :  { %v1351_v12 = vpack.c.bf16 %v15_v10, %v14_v9  ;;  %v18_v13 = vld [vmem:[%s1943_s1 + $0x8] sm:$0xff]  ;;  %v20_v14 = vand.u32 2147483647, %v17_v11  ;;  %v19_v20 = vld [vmem:[%s1943_s1 + $0x10] sm:$0xff]  ;;  %v31_v22 = vld [vmem:[%s1941_s2 + $0x40] sm:$0xff] }
   0x6   :  { %56 = vperm.xlu1 %1372, %v26_v3   ;;  %50 = vperm.xlu0 %1371, %v24_v4   ;;  %v21_v15 = vand.u32 2147483647, %v18_v13  ;;  %v32_v21 = vld [vmem:[%s1941_s2 + $0x48] sm:$0xff]  ;;  %v1497_v23 = vand.u32 2147483647, %v19_v20  ;;  %v34_v24 = vld [vmem:[%s1941_s2 + $0x58] sm:$0xff] }
   0x7   :  { %1352 = vmatpush3.bf16.msra.mxu0 %v1351_v12  ;;  %v33_v25 = vld [vmem:[%s1941_s2 + $0x50] sm:$0xff]  ;;  %v36_v26 = vld [vmem:[%s1941_s2 + $0x68] sm:$0xff]  ;;  %v35_v27 = vld [vmem:[%s1941_s2 + $0x60] sm:$0xff] }
   0x8   :  { %v1354_v18 = vpack.c.bf16 %v21_v15, %v20_v14  ;;  %1216 = vmatprep.subr.mxu0 %v1422_v6  ;;  %v38_v28 = vld [vmem:[%s1941_s2 + $0x78] sm:$0xff]  ;;  %v37_v29 = vld [vmem:[%s1941_s2 + $0x70] sm:$0xff]  ;;  %v40_v30 = vld [vmem:[%s1941_s2 + $0x88] sm:$0xff] }
   0x9   :  { %v39_v31 = vld [vmem:[%s1941_s2 + $0x80] sm:$0xff]  ;;  %v42_v32 = vld [vmem:[%s1941_s2 + $0x98] sm:$0xff]  ;;  %v41_v33 = vld [vmem:[%s1941_s2 + $0x90] sm:$0xff] }
   0xa   :  { %62 = vperm.xlu1 %1372, %v28_v7   ;;  %59 = vperm.xlu0 %1371, %v27_v8   ;;  %v43_v34 = vld [vmem:[%s1941_s2 + $0xa0] sm:$0xff] }
   0xb   :  { %1355 = vmatpush3.bf16.msra.mxu1 %v1354_v18  ;;  %1217 = vmatpush3.msra.mxu0 %v16_v19 }
   0xc   :  { %1285 = vmatprep.subr.mxu1 %v1422_v6 }
   0xe   :  { %68 = vperm.xlu1 %1372, %v30_v16   ;;  %65 = vperm.xlu0 %1371, %v29_v17  }
   0xf   :  { %1286 = vmatpush3.msra.mxu1 %v1497_v23 }
  0x12   :  { %74 = vperm.xlu1 %1372, %v32_v21   ;;  %71 = vperm.xlu0 %1371, %v31_v22  }
  0x16   :  { %80 = vperm.xlu1 %1372, %v34_v24   ;;  %77 = vperm.xlu0 %1371, %v33_v25  }
  0x1a   :  { %86 = vperm.xlu1 %1372, %v36_v26   ;;  %83 = vperm.xlu0 %1371, %v35_v27  }
  0x1e   :  { %92 = vperm.xlu1 %1372, %v38_v28   ;;  %89 = vperm.xlu0 %1371, %v37_v29  }
  0x22   :  { %98 = vperm.xlu1 %1372, %v40_v30   ;;  %95 = vperm.xlu0 %1371, %v39_v31  }
  0x26   :  { %104 = vperm.xlu1 %1372, %v42_v32   ;;  %101 = vperm.xlu0 %1371, %v41_v33  }
  0x2a   :  { %107 = vperm.xlu0 %1371, %v43_v34  }
  0x81   :  { %v48_v37 = vpop.permute.xlu0 %47  ;;  %v54_v39 = vpop.permute.xlu1 %53 }
  0x82   :  { %vm109_vm2 = vcmp.eq.s32.totalorder %v48_v37, %v1534_v36  ;;  %vm111_vm3 = vcmp.eq.s32.totalorder %v54_v39, %v1534_v36 }
  0x83   :  { %v1087_v38 = vsel %vm109_vm2, 1.0, %v1422_v6  ;;  %v1089_v42 = vsel %vm111_vm3, 1.0, %v1422_v6 }
  0x84   :  { %1219 = vmatmul.mubr.msk.f32.vlgmr.msra.gmra.mrb[0].mxu0 %vm172_vm1, %v1087_v38  ;;  %1288 = vmatmul.mubr.msk.f32.vlgmr.msra.gmra.mrb[0].mxu1 %vm172_vm1, %v1087_v38 }
  0x85   :  { %v51_v40 = vpop.permute.xlu0 %50  ;;  %1221 = vmatprep.mubr.msk.f32.mxu0 %vm1421_vm0, %v1422_v6  ;;  %1290 = vmatprep.mubr.msk.f32.mxu1 %vm1421_vm0, %v1422_v6  ;;  %v57_v43 = vpop.permute.xlu1 %56 }
  0x86   :  { %vm110_vm4 = vcmp.eq.s32.totalorder %v51_v40, %v1534_v36  ;;  %vm112_vm5 = vcmp.eq.s32.totalorder %v57_v43, %v1534_v36 }
  0x87   :  { %v1088_v41 = vsel %vm110_vm4, 1.0, %v1422_v6  ;;  %v1090_v45 = vsel %vm112_vm5, 1.0, %v1422_v6 }
  0x88   :  { %1222 = vmatmul.mubr.msk.f32.gmra.mrb[2].mxu0 %vm172_vm1, %v1088_v41  ;;  %1291 = vmatmul.mubr.msk.f32.gmra.mrb[2].mxu1 %vm172_vm1, %v1088_v41 }
  0x89   :  { %1224 = vmatprep.mubr.msk.f32.mxu0 %vm1421_vm0, %v1422_v6  ;;  %1293 = vmatprep.mubr.msk.f32.mxu1 %vm1421_vm0, %v1422_v6  ;;  %v60_v44 = vpop.permute.xlu0 %59  ;;  %v63_v46 = vpop.permute.xlu1 %62 }
  0x8a   :  { %vm113_vm6 = vcmp.eq.s32.totalorder %v60_v44, %v1534_v36  ;;  %vm114_vm7 = vcmp.eq.s32.totalorder %v63_v46, %v1534_v36 }
  0x8b   :  { %v1091_v47 = vsel %vm113_vm6, 1.0, %v1422_v6  ;;  %v1092_v49 = vsel %vm114_vm7, 1.0, %v1422_v6 }
  0x8c   :  { %1225 = vmatmul.mubr.msk.f32.gmra.mrb[4].mxu0 %vm172_vm1, %v1089_v42  ;;  %1294 = vmatmul.mubr.msk.f32.gmra.mrb[4].mxu1 %vm172_vm1, %v1089_v42 }
  0x8d   :  { %1227 = vmatprep.mubr.msk.f32.mxu0 %vm1421_vm0, %v1422_v6  ;;  %1296 = vmatprep.mubr.msk.f32.mxu1 %vm1421_vm0, %v1422_v6  ;;  %v66_v48 = vpop.permute.xlu0 %65  ;;  %v69_v50 = vpop.permute.xlu1 %68 }
  0x8e   :  { %vm115_vm8 = vcmp.eq.s32.totalorder %v66_v48, %v1534_v36  ;;  %vm116_vm9 = vcmp.eq.s32.totalorder %v69_v50, %v1534_v36 }
  0x8f   :  { %v1093_v51 = vsel %vm115_vm8, 1.0, %v1422_v6  ;;  %v1094_v53 = vsel %vm116_vm9, 1.0, %v1422_v6 }
  0x90   :  { %1228 = vmatmul.mubr.msk.f32.gmra.mrb[6].mxu0 %vm172_vm1, %v1090_v45  ;;  %1297 = vmatmul.mubr.msk.f32.gmra.mrb[6].mxu1 %vm172_vm1, %v1090_v45 }
  0x91   :  { %1230 = vmatprep.mubr.msk.f32.mxu0 %vm1421_vm0, %v1422_v6  ;;  %1299 = vmatprep.mubr.msk.f32.mxu1 %vm1421_vm0, %v1422_v6  ;;  %v72_v52 = vpop.permute.xlu0 %71  ;;  %v75_v54 = vpop.permute.xlu1 %74 }
  0x92   :  { %vm117_vm10 = vcmp.eq.s32.totalorder %v72_v52, %v1534_v36  ;;  %vm118_vm11 = vcmp.eq.s32.totalorder %v75_v54, %v1534_v36 }
  0x93   :  { %v1095_v55 = vsel %vm117_vm10, 1.0, %v1422_v6  ;;  %v1096_v57 = vsel %vm118_vm11, 1.0, %v1422_v6 }
  0x94   :  { %1231 = vmatmul.mubr.msk.f32.gmra.mrb[8].mxu0 %vm172_vm1, %v1091_v47  ;;  %1300 = vmatmul.mubr.msk.f32.gmra.mrb[8].mxu1 %vm172_vm1, %v1091_v47 }
  0x95   :  { %1233 = vmatprep.mubr.msk.f32.mxu0 %vm1421_vm0, %v1422_v6  ;;  %1302 = vmatprep.mubr.msk.f32.mxu1 %vm1421_vm0, %v1422_v6  ;;  %v78_v56 = vpop.permute.xlu0 %77  ;;  %v81_v58 = vpop.permute.xlu1 %80 }
  0x96   :  { %vm119_vm12 = vcmp.eq.s32.totalorder %v78_v56, %v1534_v36  ;;  %vm120_vm13 = vcmp.eq.s32.totalorder %v81_v58, %v1534_v36 }
  0x97   :  { %v1097_v59 = vsel %vm119_vm12, 1.0, %v1422_v6  ;;  %v1098_v61 = vsel %vm120_vm13, 1.0, %v1422_v6 }
  0x98   :  { %1234 = vmatmul.mubr.msk.f32.gmra.mrb[10].mxu0 %vm172_vm1, %v1092_v49  ;;  %1303 = vmatmul.mubr.msk.f32.gmra.mrb[10].mxu1 %vm172_vm1, %v1092_v49 }
  0x99   :  { %1236 = vmatprep.mubr.msk.f32.mxu0 %vm1421_vm0, %v1422_v6  ;;  %1305 = vmatprep.mubr.msk.f32.mxu1 %vm1421_vm0, %v1422_v6  ;;  %v84_v60 = vpop.permute.xlu0 %83  ;;  %v87_v62 = vpop.permute.xlu1 %86 }
  0x9a   :  { %vm121_vm14 = vcmp.eq.s32.totalorder %v84_v60, %v1534_v36  ;;  %vm122_vm15 = vcmp.eq.s32.totalorder %v87_v62, %v1534_v36 }
  0x9b   :  { %v1099_v63 = vsel %vm121_vm14, 1.0, %v1422_v6  ;;  %v1100_v1 = vsel %vm122_vm15, 1.0, %v1422_v6 }
  0x9c   :  { %1237 = vmatmul.mubr.msk.f32.gmra.mrb[12].mxu0 %vm172_vm1, %v1093_v51  ;;  %1306 = vmatmul.mubr.msk.f32.gmra.mrb[12].mxu1 %vm172_vm1, %v1093_v51 }
  0x9d   :  { %1239 = vmatprep.mubr.msk.f32.mxu0 %vm1421_vm0, %v1422_v6  ;;  %1308 = vmatprep.mubr.msk.f32.mxu1 %vm1421_vm0, %v1422_v6  ;;  %v90_v0 = vpop.permute.xlu0 %89  ;;  %v93_v2 = vpop.permute.xlu1 %92 }
  0x9e   :  { %vm123_vm2 = vcmp.eq.s32.totalorder %v90_v0, %v1534_v36  ;;  %vm124_vm3 = vcmp.eq.s32.totalorder %v93_v2, %v1534_v36 }
  0x9f   :  { %v1101_v3 = vsel %vm123_vm2, 1.0, %v1422_v6  ;;  %v1102_v5 = vsel %vm124_vm3, 1.0, %v1422_v6 }
  0xa0   :  { %1240 = vmatmul.mubr.msk.f32.gmra.mrb[14].mxu0 %vm172_vm1, %v1094_v53  ;;  %1309 = vmatmul.mubr.msk.f32.gmra.mrb[14].mxu1 %vm172_vm1, %v1094_v53 }
  0xa1   :  { %1242 = vmatprep.mubr.msk.f32.mxu0 %vm1421_vm0, %v1422_v6  ;;  %1311 = vmatprep.mubr.msk.f32.mxu1 %vm1421_vm0, %v1422_v6  ;;  %v96_v4 = vpop.permute.xlu0 %95  ;;  %v99_v7 = vpop.permute.xlu1 %98 }
  0xa2   :  { %vm125_vm4 = vcmp.eq.s32.totalorder %v96_v4, %v1534_v36  ;;  %vm126_vm5 = vcmp.eq.s32.totalorder %v99_v7, %v1534_v36 }
  0xa3   :  { %v1103_v8 = vsel %vm125_vm4, 1.0, %v1422_v6  ;;  %v1104_v10 = vsel %vm126_vm5, 1.0, %v1422_v6 }
  0xa4   :  { %1243 = vmatmul.mubr.msk.f32.gmra.mrb[16].mxu0 %vm172_vm1, %v1095_v55  ;;  %1312 = vmatmul.mubr.msk.f32.gmra.mrb[16].mxu1 %vm172_vm1, %v1095_v55  ;;  %v1423_v55 = vmov 1.0  }
  0xa5   :  { %1245 = vmatprep.mubr.msk.f32.mxu0 %vm1421_vm0, %v1422_v6  ;;  %1314 = vmatprep.mubr.msk.f32.mxu1 %vm1421_vm0, %v1422_v6  ;;  %v102_v9 = vpop.permute.xlu0 %101  ;;  %v105_v12 = vpop.permute.xlu1 %104 }
  0xa6   :  { %vm127_vm6 = vcmp.eq.s32.totalorder %v102_v9, %v1534_v36  ;;  %vm128_vm7 = vcmp.eq.s32.totalorder %v105_v12, %v1534_v36 }
  0xa7   :  { %v1105_v11 = vsel %vm127_vm6, 1.0, %v1422_v6  ;;  %v1106_v14 = vsel %vm128_vm7, 1.0, %v1422_v6 }
  0xa8   :  { %1246 = vmatmul.mubr.msk.f32.gmra.mrb[18].mxu0 %vm172_vm1, %v1096_v57  ;;  %1315 = vmatmul.mubr.msk.f32.gmra.mrb[18].mxu1 %vm172_vm1, %v1096_v57 }
  0xa9   :  { %1248 = vmatprep.mubr.msk.f32.mxu0 %vm1421_vm0, %v1422_v6  ;;  %1317 = vmatprep.mubr.msk.f32.mxu1 %vm1421_vm0, %v1422_v6  ;;  %v108_v13 = vpop.permute.xlu0 %107 }
  0xaa   :  { %vm129_vm8 = vcmp.eq.s32.totalorder %v108_v13, %v1534_v36 }
  0xab   :  { %v1107_v15 = vsel %vm129_vm8, 1.0, %v1422_v6 }
  0xac   :  { %1249 = vmatmul.mubr.msk.f32.gmra.mrb[20].mxu0 %vm172_vm1, %v1097_v59 }
  0xad   :  { %1251 = vmatprep.mubr.msk.f32.mxu0 %vm1421_vm0, %v1422_v6 }
  0xb0   :  { %1252 = vmatmul.mubr.msk.f32.gmra.mrb[22].mxu0 %vm172_vm1, %v1098_v61  ;;  %1318 = vmatmul.mubr.msk.f32.gmra.mrb[18].mxu1 %vm172_vm1, %v1097_v59 }
  0xb1   :  { %1254 = vmatprep.mubr.msk.f32.mxu0 %vm1421_vm0, %v1422_v6  ;;  %1320 = vmatprep.mubr.msk.f32.mxu1 %vm1421_vm0, %v1422_v6 }
  0xb4   :  { %1255 = vmatmul.mubr.msk.f32.gmra.mrb[24].mxu0 %vm172_vm1, %v1099_v63  ;;  %1321 = vmatmul.mubr.msk.f32.gmra.mrb[20].mxu1 %vm172_vm1, %v1098_v61 }
  0xb5   :  { %1257 = vmatprep.mubr.msk.f32.mxu0 %vm1421_vm0, %v1422_v6  ;;  %1323 = vmatprep.mubr.msk.f32.mxu1 %vm1421_vm0, %v1422_v6 }
  0xb8   :  { %1258 = vmatmul.mubr.msk.f32.gmra.mrb[26].mxu0 %vm172_vm1, %v1100_v1 }
  0xb9   :  { %1260 = vmatprep.mubr.msk.f32.mxu0 %vm1421_vm0, %v1422_v6 }
  0xbc   :  { %1261 = vmatmul.mubr.msk.f32.gmra.mrb[28].mxu0 %vm172_vm1, %v1101_v3  ;;  %1324 = vmatmul.mubr.msk.f32.gmra.mrb[20].mxu1 %vm172_vm1, %v1099_v63 }
  0xbd   :  { %1263 = vmatprep.mubr.msk.f32.mxu0 %vm1421_vm0, %v1422_v6  ;;  %1326 = vmatprep.mubr.msk.f32.mxu1 %vm1421_vm0, %v1422_v6 }
  0xc0   :  { %1264 = vmatmul.mubr.msk.f32.gmra.mrb[30].mxu0 %vm172_vm1, %v1102_v5  ;;  %1327 = vmatmul.mubr.msk.f32.gmra.mrb[22].mxu1 %vm172_vm1, %v1100_v1 }
  0xc1   :  { %1266 = vmatprep.mubr.msk.f32.mxu0 %vm1421_vm0, %v1422_v6  ;;  %1329 = vmatprep.mubr.msk.f32.mxu1 %vm1421_vm0, %v1422_v6 }
  0xc4   :  { %1267 = vmatmul.mubr.msk.f32.gmra.mrb[32].mxu0 %vm172_vm1, %v1103_v8  ;;  %1330 = vmatmul.mubr.msk.f32.gmra.mrb[24].mxu1 %vm172_vm1, %v1101_v3 }
  0xc5   :  { %1269 = vmatprep.mubr.msk.f32.mxu0 %vm1421_vm0, %v1422_v6  ;;  %1332 = vmatprep.mubr.msk.f32.mxu1 %vm1421_vm0, %v1422_v6 }
  0xc8   :  { %1270 = vmatmul.mubr.msk.f32.gmra.mrb[34].mxu0 %vm172_vm1, %v1104_v10  ;;  %1333 = vmatmul.mubr.msk.f32.gmra.mrb[26].mxu1 %vm172_vm1, %v1102_v5 }
  0xc9   :  { %1272 = vmatprep.mubr.msk.f32.mxu0 %vm1421_vm0, %v1422_v6  ;;  %1335 = vmatprep.mubr.msk.f32.mxu1 %vm1421_vm0, %v1422_v6 }
  0xcc   :  { %1273 = vmatmul.mubr.msk.f32.gmra.mrb[36].mxu0 %vm172_vm1, %v1105_v11  ;;  %1336 = vmatmul.mubr.msk.f32.gmra.mrb[28].mxu1 %vm172_vm1, %v1103_v8 }
  0xcd   :  { %1338 = vmatprep.mubr.msk.f32.mxu1 %vm1421_vm0, %v1422_v6  ;;  %1275 = vmatprep.mubr.msk.f32.mxu0 %vm1421_vm0, %v1422_v6 }
  0xd0   :  { %1339 = vmatmul.mubr.msk.f32.gmra.mrb[30].mxu1 %vm172_vm1, %v1104_v10 }
  0xd1   :  { %1341 = vmatprep.mubr.msk.f32.mxu1 %vm1421_vm0, %v1422_v6 }
  0xd4   :  { %1276 = vmatmul.mubr.msk.f32.gmra.mrb[36].mxu0 %vm172_vm1, %v1106_v14  ;;  %1342 = vmatmul.mubr.msk.f32.gmra.mrb[32].mxu1 %vm172_vm1, %v1105_v11 }
  0xd5   :  { %1278 = vmatprep.mubr.msk.f32.mxu0 %vm1421_vm0, %v1422_v6  ;;  %1344 = vmatprep.mubr.msk.f32.mxu1 %vm1421_vm0, %v1422_v6 }
  0xd8   :  { %1279 = vmatmul.mubr.msk.f32.gmra.mrb[38].mxu0 %vm172_vm1, %v1107_v15 }
  0xdc   :  { %1345 = vmatmul.mubr.msk.f32.gmra.mrb[32].mxu1 %vm172_vm1, %v1106_v14 }
  0xdd   :  { %1347 = vmatprep.mubr.msk.f32.mxu1 %vm1421_vm0, %v1422_v6  ;;  %vm589_vm0 = vcmask 261120  }
  0xe0   :  { %1348 = vmatmul.mubr.msk.f32.gmra.mrb[34].mxu1 %vm172_vm1, %v1107_v15 }
 0x157   :  { %v302_v16 = vpop.f32.mrb[0].mxu0  ;;  %v472_v17 = vpop.f32.mrb[0].mxu1 }
 0x158   :  { %v1220_v18 = vpop.f32.mrb[1].mxu0  ;;  %v1289_v19 = vpop.f32.mrb[1].mxu1  ;;  %v576_v54 = vmul.f32 %v302_v16, %v302_v16 }
 0x15a   :  { %v590_v4 = vsel %vm589_vm0, %v576_v54, 0.0 }
 0x15b   :  { %v307_v20 = vpop.f32.mrb[2].mxu0  ;;  %v477_v21 = vpop.f32.mrb[2].mxu1 }
 0x15c   :  { %v746_v22 = vsub.f32 %v302_v16, %v307_v20  ;;  %v1223_v24 = vpop.f32.mrb[3].mxu0  ;;  %v1292_v25 = vpop.f32.mrb[3].mxu1  ;;  %v577_v44 = vmul.f32 %v307_v20, %v307_v20 }
 0x15e   :  { %v747_v26 = vand.u32 2147483647, %v746_v22  ;;  %v593_v57 = vsel %vm589_vm0, %v577_v44, 0.0 }
 0x15f   :  { %v312_v27 = vpop.f32.mrb[4].mxu0  ;;  %v482_v28 = vpop.f32.mrb[4].mxu1 }
 0x160   :  { %v748_v29 = vadd.f32 %v747_v26, %v472_v17  ;;  %v773_v30 = vsub.f32 %v312_v27, %v482_v28  ;;  %v776_v31 = vadd.f32 %v482_v28, %v312_v27  ;;  %v1226_v32 = vpop.f32.mrb[5].mxu0  ;;  %v1295_v33 = vpop.f32.mrb[5].mxu1  ;;  %v578_v34 = vmul.f32 %v312_v27, %v312_v27 }
 0x162   :  { %v749_v35 = vsub.f32 %v748_v29, %v477_v21  ;;  %v596_v36 = vsel %vm589_vm0, %v578_v34, 0.0 }
 0x163   :  { %v487_v37 = vpop.f32.mrb[6].mxu1  ;;  %597 = vadd.xlane.f32.xlu0 %v596_v36  ;;  %v317_v38 = vpop.f32.mrb[6].mxu0 }
 0x164   :  { %v774_v39 = vsub.f32 %v317_v38, %v487_v37  ;;  %v777_v40 = vadd.f32 %v487_v37, %v317_v38  ;;  %v1229_v41 = vpop.f32.mrb[7].mxu0  ;;  %v1298_v42 = vpop.f32.mrb[7].mxu1  ;;  %v579_v43 = vmul.f32 %v317_v38, %v317_v38  ;;  %v750_v58 = vmax.f32 %v749_v35, 0.0 }
 0x166   :  { %v775_v45 = vmax.f32 %v773_v30, %v774_v39  ;;  %v778_v46 = vmin.f32 %v776_v31, %v777_v40  ;;  %v599_v47 = vsel %vm589_vm0, %v579_v43, 0.0  ;;  %v751_v5 = vmul.f32 %v750_v58, %v750_v58 }
 0x167   :  { %v1702_v48 = vpop.f32.mrb[8].mxu1  ;;  %600 = vadd.xlane.f32.xlu0 %v599_v47  ;;  %v322_v49 = vpop.f32.mrb[8].mxu0 }
 0x168   :  { %v779_v50 = vsub.f32 %v775_v45, %v778_v46  ;;  %v793_v51 = vadd.f32 %v778_v46, %v775_v45  ;;  %v1232_v52 = vpop.f32.mrb[9].mxu0  ;;  %v1301_v53 = vpop.f32.mrb[9].mxu1  ;;  %vm795_vm1 = vcmp.gt.f32.partialorder %v775_v45, %v778_v46  ;;  %v580_v18 = vmul.f32 %v322_v49, %v322_v49 }
 0x169   :  { %v1704_v56 = vsel %vm795_vm1, 0.0, %v1423_v55  ;;  %v752_v19 = vsel %vm589_vm0, %v751_v5, 0.0 }
 0x16a   :  { %v794_v59 = vmul.f32 0.5, %v793_v51  ;;  %v797_v60 = vsel %vm589_vm0, %v1704_v56, inf  ;;  %v780_v61 = vmax.f32 %v779_v50, 0.0  ;;  %v792_v7 = vmul.f32 0.5, %v779_v50 }
 0x16b   :  { %v497_v62 = vpop.f32.mrb[10].mxu1  ;;  %798 = vmin.xlane.f32.xlu1 %v797_v60  ;;  %594 = vadd.xlane.f32.xlu0 %v593_v57  ;;  %v1709_v63 = vpop.f32.mrb[10].mxu0  ;;  %v602_v28 = vsel %vm589_vm0, %v580_v18, 0.0 }
 0x16c   :  { %v801_v0 = vsub.f32 %v794_v59, %v322_v49  ;;  %v1235_v1 = vpop.f32.mrb[11].mxu0  ;;  %v1304_v2 = vpop.f32.mrb[11].mxu1  ;;  %v781_v3 = vmul.f32 %v780_v61, %v780_v61  ;;  %v581_v27 = vmul.f32 %v1709_v63, %v1709_v63 }
 0x16e   :  { %v802_v8 = vand.u32 2147483647, %v801_v0  ;;  %v782_v9 = vsel %vm589_vm0, %v781_v3, 0.0  ;;  %v605_v34 = vsel %vm589_vm0, %v581_v27, 0.0 }
 0x16f   :  { %v502_v10 = vpop.f32.mrb[12].mxu1  ;;  %591 = vadd.xlane.f32.xlu1 %v590_v4  ;;  %783 = vadd.xlane.f32.xlu0 %v782_v9  ;;  %v332_v11 = vpop.f32.mrb[12].mxu0 }
 0x170   :  { %v1713_v12 = vadd.f32 %v802_v8, %v792_v7  ;;  %v1715_v13 = vadd.f32 %v502_v10, %v497_v62  ;;  %v582_v14 = vmul.f32 %v332_v11, %v332_v11  ;;  %v859_v15 = vsub.f32 %v1709_v63, %v332_v11  ;;  %v1238_v16 = vpop.f32.mrb[13].mxu0  ;;  %v1307_v17 = vpop.f32.mrb[13].mxu1 }
 0x172   :  { %v608_v20 = vsel %vm589_vm0, %v582_v14, 0.0  ;;  %v804_v21 = vsub.f32 %v1713_v12, %v1702_v48 }
 0x173   :  { %v1722_v22 = vpop.f32.mrb[14].mxu1  ;;  %753 = vadd.xlane.f32.xlu1 %v752_v19  ;;  %609 = vadd.xlane.f32.xlu0 %v608_v20  ;;  %v337_v24 = vpop.f32.mrb[14].mxu0 }
 0x174   :  { %v1241_v25 = vpop.f32.mrb[15].mxu0  ;;  %v1310_v26 = vpop.f32.mrb[15].mxu1  ;;  %v583_v33 = vmul.f32 %v337_v24, %v337_v24 }
 0x176   :  { %v611_v38 = vsel %vm589_vm0, %v583_v33, 0.0 }
 0x177   :  { %v1727_v29 = vpop.f32.mrb[16].mxu1  ;;  %603 = vadd.xlane.f32.xlu1 %v602_v28  ;;  %v1729_v30 = vpop.f32.mrb[16].mxu0 }
 0x178   :  { %v1244_v31 = vpop.f32.mrb[17].mxu0  ;;  %v1313_v32 = vpop.f32.mrb[17].mxu1 }
 0x17b   :  { %606 = vadd.xlane.f32.xlu1 %v605_v34  ;;  %v347_v35 = vpop.f32.mrb[18].mxu0 }
 0x17c   :  { %v1247_v36 = vpop.f32.mrb[19].mxu0  ;;  %v585_v37 = vmul.f32 %v347_v35, %v347_v35 }
 0x17e   :  { %v617_v44 = vsel %vm589_vm0, %v585_v37, 0.0 }
 0x17f   :  { %612 = vadd.xlane.f32.xlu1 %v611_v38  ;;  %v352_v39 = vpop.f32.mrb[20].mxu0 }
 0x180   :  { %v586_v40 = vmul.f32 %v352_v39, %v352_v39  ;;  %v917_v41 = vsub.f32 %v347_v35, %v352_v39  ;;  %v1250_v42 = vpop.f32.mrb[21].mxu0 }
 0x182   :  { %v918_v43 = vand.u32 2147483647, %v917_v41  ;;  %v620_v45 = vsel %vm589_vm0, %v586_v40, 0.0 }
 0x183   :  { %v522_v46 = vpop.f32.mrb[18].mxu1  ;;  %618 = vadd.xlane.f32.xlu1 %v617_v44  ;;  %621 = vadd.xlane.f32.xlu0 %v620_v45  ;;  %v357_v47 = vpop.f32.mrb[22].mxu0 }
 0x184   :  { %v919_v49 = vsub.f32 0.0, %v918_v43  ;;  %v587_v50 = vmul.f32 %v357_v47, %v357_v47  ;;  %v1253_v51 = vpop.f32.mrb[23].mxu0  ;;  %v1319_v52 = vpop.f32.mrb[19].mxu1 }
 0x186   :  { %v1356_v53 = vadd.f32 %v919_v49, %v522_v46  ;;  %v623_v54 = vsel %vm589_vm0, %v587_v50, 0.0 }
 0x187   :  { %624 = vadd.xlane.f32.xlu0 %v623_v54  ;;  %v362_v55 = vpop.f32.mrb[24].mxu0 }
 0x188   :  { %v922_v57 = vmax.f32 %v1356_v53, 0.0  ;;  %v945_v58 = vsub.f32 %v357_v47, %v362_v55  ;;  %v1256_v59 = vpop.f32.mrb[25].mxu0  ;;  %v588_v62 = vmul.f32 %v362_v55, %v362_v55 }
 0x18a   :  { %v923_v60 = vmul.f32 %v922_v57, %v922_v57  ;;  %v626_v9 = vsel %vm589_vm0, %v588_v62, 0.0 }
 0x18b   :  { %v367_v61 = vpop.f32.mrb[26].mxu0 }
 0x18c   :  { %v860_v63 = vsub.f32 %v859_v15, %v367_v61  ;;  %v1259_v0 = vpop.f32.mrb[27].mxu0  ;;  %v924_v1 = vsel %vm589_vm0, %v923_v60, 0.0 }
 0x18d   :  { %925 = vadd.xlane.f32.xlu1 %v924_v1 }
 0x18e   :  { %v861_v2 = vand.u32 2147483647, %v860_v63 }
 0x18f   :  { %v372_v3 = vpop.f32.mrb[28].mxu0  ;;  %v532_v4 = vpop.f32.mrb[20].mxu1 }
 0x190   :  { %v888_v5 = vadd.f32 %v372_v3, %v337_v24  ;;  %v1262_v7 = vpop.f32.mrb[29].mxu0  ;;  %v1325_v8 = vpop.f32.mrb[21].mxu1  ;;  %v1739_v10 = vadd.f32 %v1715_v13, %v861_v2 }
 0x191   :  { %627 = vadd.xlane.f32.xlu1 %v626_v9 }
 0x192   :  { %v889_v11 = vsub.f32 %v888_v5, %v1729_v30 }
 0x193   :  { %v377_v14 = vpop.f32.mrb[30].mxu0  ;;  %v1742_v15 = vpop.f32.mrb[22].mxu1 }
 0x194   :  { %v946_v16 = vsub.f32 %v945_v58, %v377_v14  ;;  %v864_v17 = vsub.f32 %v1739_v10, %v1742_v15  ;;  %v1265_v18 = vpop.f32.mrb[31].mxu0  ;;  %v1328_v19 = vpop.f32.mrb[23].mxu1  ;;  %v890_v26 = vand.u32 2147483647, %v889_v11 }
 0x196   :  { %v947_v20 = vand.u32 2147483647, %v946_v16 }
 0x197   :  { %v382_v24 = vpop.f32.mrb[32].mxu0  ;;  %v542_v25 = vpop.f32.mrb[24].mxu1 }
 0x198   :  { %v891_v27 = vadd.f32 %v542_v25, %v1722_v22  ;;  %v1268_v13 = vpop.f32.mrb[33].mxu0  ;;  %v1331_v28 = vpop.f32.mrb[25].mxu1  ;;  %v949_v31 = vsub.f32 %v947_v20, %v532_v4  ;;  %v584_v20 = vmul.f32 %v1729_v30, %v1729_v30 }
 0x19a   :  { %v892_v32 = vadd.f32 %v891_v27, %v890_v26  ;;  %v614_v30 = vsel %vm589_vm0, %v584_v20, 0.0 }
 0x19b   :  { %v387_v33 = vpop.f32.mrb[34].mxu0  ;;  %v547_v34 = vpop.f32.mrb[26].mxu1 }
 0x19c   :  { %v977_v35 = vsub.f32 %v382_v24, %v387_v33  ;;  %v950_v36 = vsub.f32 %v949_v31, %v547_v34  ;;  %v1271_v37 = vpop.f32.mrb[35].mxu0  ;;  %v1334_v38 = vpop.f32.mrb[27].mxu1  ;;  %v893_v39 = vsub.f32 %v892_v32, %v1727_v29  ;;  %v865_v24 = vmax.f32 %v864_v17, 0.0 }
 0x19e   :  { %v978_v22 = vand.u32 2147483647, %v977_v35  ;;  %v894_v40 = vmax.f32 %v893_v39, 0.0  ;;  %v951_v26 = vsub.f32 0.0, %v950_v36  ;;  %v866_v13 = vmul.f32 %v865_v24, %v865_v24 }
 0x19f   :  { %v552_v41 = vpop.f32.mrb[28].mxu1 }
 0x1a0   :  { %v979_v42 = vadd.f32 %v978_v22, %v552_v41  ;;  %v1337_v29 = vpop.f32.mrb[29].mxu1  ;;  %v895_v43 = vmul.f32 %v894_v40, %v894_v40  ;;  %v953_v15 = vmax.f32 %v951_v26, 0.0  ;;  %v867_v41 = vsel %vm589_vm0, %v866_v13, 0.0 }
 0x1a2   :  { %v896_v44 = vsel %vm589_vm0, %v895_v43, 0.0  ;;  %v954_v22 = vmul.f32 %v953_v15, %v953_v15 }
 0x1a3   :  { %v557_v45 = vpop.f32.mrb[30].mxu1  ;;  %897 = vadd.xlane.f32.xlu1 %v896_v44 }
 0x1a4   :  { %v980_v46 = vsub.f32 %v979_v42, %v557_v45  ;;  %v1340_v47 = vpop.f32.mrb[31].mxu1  ;;  %v1029_v45 = vmul.f32 %v1497_v23, %v1497_v23 }
 0x1a6   :  { %v981_v49 = vmax.f32 %v980_v46, 0.0 }
 0x1a7   :  { %v397_v50 = vpop.f32.mrb[36].mxu0 }
 0x1a8   :  { %v982_v51 = vmul.f32 %v981_v49, %v981_v49  ;;  %v1277_v52 = vpop.f32.mrb[37].mxu0 }
 0x1aa   :  { %v983_v53 = vsel %vm589_vm0, %v982_v51, 0.0 }
 0x1ab   :  { %984 = vadd.xlane.f32.xlu1 %v983_v53  ;;  %v402_v6 = vpop.f32.mrb[38].mxu0  ;;  %v1030_v53 = vsel %vm589_vm0, %v1029_v45, 0.0 }
 0x1ac   :  { %v1003_v54 = vsub.f32 %v397_v50, %v402_v6  ;;  %v1280_v55 = vpop.f32.mrb[39].mxu0  ;;  %v955_v50 = vsel %vm589_vm0, %v954_v22, 0.0 }
 0x1ae   :  { %v1004_v57 = vand.u32 2147483647, %v1003_v54 }
 0x1af   :  { %v567_v58 = vpop.f32.mrb[32].mxu1 }
 0x1b0   :  { %v1357_v59 = vadd.f32 %v1004_v57, %v567_v58  ;;  %v1346_v60 = vpop.f32.mrb[33].mxu1 }
 0x1b3   :  { %v572_v61 = vpop.f32.mrb[34].mxu1 }
 0x1b4   :  { %v1007_v62 = vsub.f32 %v1357_v59, %v572_v61  ;;  %v1349_v63 = vpop.f32.mrb[35].mxu1 }
 0x1b6   :  { %v1008_v0 = vmax.f32 %v1007_v62, 0.0 }
 0x1b8   :  { %v1009_v1 = vmul.f32 %v1008_v0, %v1008_v0 }
 0x1ba   :  { %v1010_v2 = vsel %vm589_vm0, %v1009_v1, 0.0 }
 0x1bb   :  { %1011 = vadd.xlane.f32.xlu1 %v1010_v2 }
 0x1f0   :  { %v1763_v3 = vpop.xlane.xlu0 %597 }
 0x1f4   :  { %v1765_v4 = vpop.xlane.xlu0 %600 }
 0x1f8   :  { %v799_v5 = vpop.xlane.xlu1 %798  ;;  %v595_v7 = vpop.xlane.xlu0 %594 }
 0x1f9   :  { %v800_v8 = vmul.f32 %v799_v5, %v1704_v56  ;;  %1373 = vrsqrt.f32 %v595_v7  ;;  %vm638_vm9 = vcmp.eq.f32.partialorder %v595_v7, inf  ;;  %v641_v27 = vand.u32 2147483648, %v595_v7 }
 0x1fa   :  { %vm640_vm10 = vcmp.eq.f32.partialorder %v595_v7, 0.0 }
 0x1fb   :  { %v805_v9 = vmul.f32 %v804_v21, %v800_v8 }
 0x1fc   :  { %v592_v11 = vpop.xlane.xlu1 %591  ;;  %v1779_v31 = vpop.xlane.xlu0 %783 }
 0x1fd   :  { %1375 = vrsqrt.f32 %v592_v11  ;;  %v806_v14 = vmax.f32 %v805_v9, 0.0  ;;  %vm631_vm11 = vcmp.eq.f32.partialorder %v592_v11, inf  ;;  %v634_v32 = vand.u32 2147483648, %v592_v11 }
 0x1fe   :  { %vm633_vm12 = vcmp.eq.f32.partialorder %v592_v11, 0.0 }
 0x1ff   :  { %v807_v19 = vmul.f32 %v806_v14, %v806_v14 }
 0x200   :  { %v754_v16 = vpop.xlane.xlu1 %753  ;;  %v1787_v43 = vpop.xlane.xlu0 %609 }
 0x201   :  { %1377 = vrsqrt.f32 %v754_v16  ;;  %v808_v48 = vsel %vm589_vm0, %v807_v19, 0.0  ;;  %vm757_vm13 = vcmp.eq.f32.partialorder %v754_v16, inf  ;;  %v760_v40 = vand.u32 2147483648, %v754_v16 }
 0x202   :  { %809 = vadd.xlane.f32.xlu0 %v808_v48  ;;  %vm759_vm14 = vcmp.eq.f32.partialorder %v754_v16, 0.0 }
 0x203   :  { %v1374_v18 = vpop.eup %1373 }
 0x204   :  { %v637_v56 = vmul.f32 %v1374_v18, %v595_v7  ;;  %v1776_v25 = vpop.xlane.xlu1 %603 }
 0x206   :  { %v639_v12 = vsel %vm638_vm9, %v595_v7, %v637_v56  ;;  %615 = vadd.xlane.f32.xlu0 %v614_v30 }
 0x207   :  { %v1376_v21 = vpop.eup %1375  ;;  %v642_v17 = vsel %vm640_vm10, %v641_v27, %v639_v12 }
 0x208   :  { %v630_v28 = vmul.f32 %v1376_v21, %v592_v11  ;;  %v1782_v10 = vpop.xlane.xlu1 %606  ;;  %v1151_v36 = vadd.f32 -1.0, %v642_v17 }
 0x20a   :  { %v632_v33 = vsel %vm631_vm11, %v592_v11, %v630_v28  ;;  %868 = vadd.xlane.f32.xlu0 %v867_v41  ;;  %v734_v46 = vand.u32 2147483647, %v1151_v36 }
 0x20b   :  { %v1378_v34 = vpop.eup %1377  ;;  %v635_v35 = vsel %vm633_vm12, %v634_v32, %v632_v33 }
 0x20c   :  { %v1150_v37 = vadd.f32 -1.0, %v635_v35  ;;  %v756_v38 = vmul.f32 %v1378_v34, %v754_v16  ;;  %v1784_v39 = vpop.xlane.xlu1 %612 }
 0x20d   :  { %vm680_vm7 = vcmp.eq.f32.partialorder %v1784_v39, inf  ;;  %v683_v35 = vand.u32 2147483648, %v1784_v39  ;;  %vm682_vm8 = vcmp.eq.f32.partialorder %v1784_v39, 0.0 }
 0x20e   :  { %v733_v42 = vand.u32 2147483647, %v1150_v37  ;;  %v758_v29 = vsel %vm757_vm13, %v754_v16, %v756_v38  ;;  %956 = vadd.xlane.f32.xlu0 %v955_v50  ;;  %vm787_vm13 = vcmp.eq.f32.partialorder %v1779_v31, inf }
 0x20f   :  { %v761_v44 = vsel %vm759_vm14, %v760_v40, %v758_v29  ;;  %vm789_vm14 = vcmp.eq.f32.partialorder %v1779_v31, 0.0 }
 0x210   :  { %v762_v47 = vadd.f32 %v761_v44, %v733_v42  ;;  %v619_v49 = vpop.xlane.xlu1 %618  ;;  %v622_v52 = vpop.xlane.xlu0 %621 }
 0x211   :  { %1379 = vrsqrt.f32 %v619_v49  ;;  %vm694_vm15 = vcmp.eq.f32.partialorder %v619_v49, inf  ;;  %v697_v0 = vand.u32 2147483648, %v619_v49  ;;  %vm696_vm2 = vcmp.eq.f32.partialorder %v619_v49, 0.0 }
 0x212   :  { %v763_v51 = vadd.f32 %v762_v47, %v734_v46  ;;  %1381 = vrsqrt.f32 %v622_v52  ;;  %1031 = vadd.xlane.f32.xlu0 %v1030_v53  ;;  %vm701_vm3 = vcmp.eq.f32.partialorder %v622_v52, inf  ;;  %v704_v7 = vand.u32 2147483648, %v622_v52 }
 0x213   :  { %vm703_vm4 = vcmp.eq.f32.partialorder %v622_v52, 0.0 }
 0x214   :  { %v764_v6 = vmul.f32 %v763_v51, %v763_v51 }
 0x216   :  { %v766_v54 = vrot.slane %v764_v6, 4 }
 0x218   :  { %v767_v55 = vadd.f32 %v766_v54, %v764_v6 }
 0x21a   :  { %v768_v57 = vrot.slane %v767_v55, 2  ;;  %v926_v58 = vpop.xlane.xlu1 %925 }
 0x21b   :  { %v1380_v59 = vpop.eup %1379  ;;  %1383 = vrsqrt.f32 %v926_v58  ;;  %vm929_vm5 = vcmp.eq.f32.partialorder %v926_v58, inf  ;;  %v932_v20 = vand.u32 2147483648, %v926_v58  ;;  %vm931_vm6 = vcmp.eq.f32.partialorder %v926_v58, 0.0 }
 0x21c   :  { %v769_v23 = vadd.f32 %v768_v57, %v767_v55  ;;  %v693_v60 = vmul.f32 %v1380_v59, %v619_v49  ;;  %v1382_v63 = vpop.eup %1381  ;;  %1385 = vrsqrt.f32 %v1784_v39 }
 0x21d   :  { %v700_v2 = vmul.f32 %v1382_v63, %v622_v52 }
 0x21e   :  { %v770_v61 = vrot.slane %v769_v23, 1  ;;  %v695_v62 = vsel %vm694_vm15, %v619_v49, %v693_v60  ;;  %v1800_v27 = vpop.xlane.xlu1 %627  ;;  %vm645_vm15 = vcmp.eq.f32.partialorder %v1763_v3, inf }
 0x21f   :  { %v698_v5 = vsel %vm696_vm2, %v697_v0, %v695_v62  ;;  %v702_v9 = vsel %vm701_vm3, %v622_v52, %v700_v2  ;;  %vm652_vm2 = vcmp.eq.f32.partialorder %v1765_v4, inf  ;;  %vm659_vm3 = vcmp.eq.f32.partialorder %v1776_v25, inf }
 0x220   :  { %v771_v1 = vadd.f32 %v770_v61, %v769_v23  ;;  %v705_v11 = vsel %vm703_vm4, %v704_v7, %v702_v9  ;;  %v1159_v14 = vadd.f32 -1.0, %v698_v5  ;;  %vm647_vm4 = vcmp.eq.f32.partialorder %v1763_v3, 0.0 }
 0x221   :  { %v1160_v18 = vadd.f32 -1.0, %v705_v11 }
 0x222   :  { %v1793_v8 = vmul.f32 0.125, %v771_v1  ;;  %v742_v24 = vand.u32 2147483647, %v1159_v14 }
 0x223   :  { %v743_v48 = vand.u32 2147483647, %v1160_v18 }
 0x224   :  { %1063 = vst [vmem:[%s1944_s3] sm:$0x1] %v1793_v8 }
 0x225   :  { %v1384_v16 = vpop.eup %1383 }
 0x226   :  { %v928_v19 = vmul.f32 %v1384_v16, %v926_v58  ;;  %v1386_v13 = vpop.eup %1385 }
 0x227   :  { %v679_v30 = vmul.f32 %v1386_v13, %v1784_v39 }
 0x228   :  { %v930_v56 = vsel %vm929_vm5, %v926_v58, %v928_v19  ;;  %vm654_vm5 = vcmp.eq.f32.partialorder %v1765_v4, 0.0 }
 0x229   :  { %v933_v26 = vsel %vm931_vm6, %v932_v20, %v930_v56  ;;  %v681_v33 = vsel %vm680_vm7, %v1784_v39, %v679_v30  ;;  %vm673_vm6 = vcmp.eq.f32.partialorder %v1787_v43, inf  ;;  %vm661_vm7 = vcmp.eq.f32.partialorder %v1776_v25, 0.0 }
 0x22a   :  { %v934_v12 = vadd.f32 %v933_v26, %v742_v24  ;;  %v684_v37 = vsel %vm682_vm8, %v683_v35, %v681_v33  ;;  %v1839_v33 = vpop.xlane.xlu0 %624  ;;  %vm675_vm8 = vcmp.eq.f32.partialorder %v1787_v43, 0.0 }
 0x22b   :  { %v1157_v40 = vadd.f32 -1.0, %v684_v37  ;;  %v648_v37 = vand.u32 2147483648, %v1763_v3 }
 0x22c   :  { %v935_v21 = vadd.f32 %v934_v12, %v743_v48  ;;  %v790_v48 = vand.u32 2147483648, %v1779_v31 }
 0x22d   :  { %v740_v46 = vand.u32 2147483647, %v1157_v40 }
 0x22e   :  { %v936_v28 = vmul.f32 %v935_v21, %v935_v21 }
 0x230   :  { %v938_v15 = vrot.slane %v936_v28, 4  ;;  %v898_v17 = vpop.xlane.xlu1 %897 }
 0x231   :  { %1387 = vrsqrt.f32 %v898_v17  ;;  %vm901_vm0 = vcmp.eq.f32.partialorder %v898_v17, inf  ;;  %v904_v45 = vand.u32 2147483648, %v898_v17  ;;  %vm903_vm1 = vcmp.eq.f32.partialorder %v898_v17, 0.0 }
 0x232   :  { %v939_v32 = vadd.f32 %v938_v15, %v936_v28 }
 0x234   :  { %v940_v34 = vrot.slane %v939_v32, 2 }
 0x236   :  { %v941_v36 = vadd.f32 %v940_v34, %v939_v32 }
 0x238   :  { %v942_v38 = vrot.slane %v941_v36, 1  ;;  %v985_v22 = vpop.xlane.xlu1 %984 }
 0x239   :  { %1389 = vrsqrt.f32 %v985_v22  ;;  %vm988_vm9 = vcmp.eq.f32.partialorder %v985_v22, inf  ;;  %v991_v52 = vand.u32 2147483648, %v985_v22  ;;  %vm990_vm10 = vcmp.eq.f32.partialorder %v985_v22, 0.0 }
 0x23a   :  { %v943_v41 = vadd.f32 %v942_v38, %v941_v36 }
 0x23b   :  { %v1388_v42 = vpop.eup %1387 }
 0x23c   :  { %v1807_v29 = vmul.f32 0.125, %v943_v41  ;;  %v900_v44 = vmul.f32 %v1388_v42, %v898_v17 }
 0x23e   :  { %1071 = vst [vmem:[%s1944_s3 + $0x4] sm:$0x1] %v1807_v29  ;;  %v902_v39 = vsel %vm901_vm0, %v898_v17, %v900_v44  ;;  %vm666_vm0 = vcmp.eq.f32.partialorder %v1782_v10, inf }
 0x23f   :  { %v905_v47 = vsel %vm903_vm1, %v904_v45, %v902_v39  ;;  %v655_v45 = vand.u32 2147483648, %v1765_v4  ;;  %vm668_vm1 = vcmp.eq.f32.partialorder %v1782_v10, 0.0 }
 0x240   :  { %v1813_v49 = vadd.f32 %v905_v47, %v740_v46 }
 0x243   :  { %v1390_v50 = vpop.eup %1389 }
 0x244   :  { %v987_v51 = vmul.f32 %v1390_v50, %v985_v22  ;;  %v662_v50 = vand.u32 2147483648, %v1776_v25 }
 0x246   :  { %v989_v53 = vsel %vm988_vm9, %v985_v22, %v987_v51 }
 0x247   :  { %v992_v6 = vsel %vm990_vm10, %v991_v52, %v989_v53 }
 0x248   :  { %v993_v54 = vmul.f32 %v992_v6, %v992_v6  ;;  %v1012_v55 = vpop.xlane.xlu1 %1011 }
 0x249   :  { %1391 = vrsqrt.f32 %v1012_v55  ;;  %vm1015_vm11 = vcmp.eq.f32.partialorder %v1012_v55, inf  ;;  %v1018_v0 = vand.u32 2147483648, %v1012_v55  ;;  %vm1017_vm12 = vcmp.eq.f32.partialorder %v1012_v55, 0.0 }
 0x24a   :  { %v995_v57 = vrot.slane %v993_v54, 4  ;;  %1393 = vrsqrt.f32 %v1779_v31 }
 0x24b   :  { %1395 = vrsqrt.f32 %v1763_v3 }
 0x24c   :  { %v996_v58 = vadd.f32 %v995_v57, %v993_v54  ;;  %1397 = vrsqrt.f32 %v1765_v4 }
 0x24d   :  { %1399 = vrsqrt.f32 %v1776_v25 }
 0x24e   :  { %v997_v59 = vrot.slane %v996_v58, 2  ;;  %1401 = vrsqrt.f32 %v1787_v43 }
 0x24f   :  { %1403 = vrsqrt.f32 %v1782_v10 }
 0x250   :  { %v998_v23 = vadd.f32 %v997_v59, %v996_v58  ;;  %1405 = vrsqrt.f32 %v1839_v33 }
 0x251   :  { %1407 = vrsqrt.f32 %v1800_v27 }
 0x252   :  { %v999_v60 = vrot.slane %v998_v23, 1 }
 0x253   :  { %v1392_v61 = vpop.eup %1391 }
 0x254   :  { %v1000_v62 = vadd.f32 %v999_v60, %v998_v23  ;;  %v1014_v63 = vmul.f32 %v1392_v61, %v1012_v55  ;;  %v1394_v24 = vpop.eup %1393 }
 0x255   :  { %v786_v56 = vmul.f32 %v1394_v24, %v1779_v31  ;;  %v1396_v13 = vpop.eup %1395 }
 0x256   :  { %v1815_v1 = vmul.f32 0.125, %v1000_v62  ;;  %v1016_v2 = vsel %vm1015_vm11, %v1012_v55, %v1014_v63  ;;  %v1398_v28 = vpop.eup %1397  ;;  %v644_v17 = vmul.f32 %v1396_v13, %v1763_v3  ;;  %vm708_vm11 = vcmp.eq.f32.partialorder %v1839_v33, inf }
 0x257   :  { %v1019_v5 = vsel %vm1017_vm12, %v1018_v0, %v1016_v2  ;;  %v788_v26 = vsel %vm787_vm13, %v1779_v31, %v786_v56  ;;  %v1400_v15 = vpop.eup %1399  ;;  %v651_v34 = vmul.f32 %v1398_v28, %v1765_v4  ;;  %v669_v2 = vand.u32 2147483648, %v1782_v10 }
 0x258   :  { %1075 = vst [vmem:[%s1944_s3 + $0x6] sm:$0x1] %v1815_v1  ;;  %v1020_v7 = vmul.f32 %v1019_v5, %v1019_v5  ;;  %v791_v12 = vsel %vm789_vm14, %v790_v48, %v788_v26  ;;  %v1402_v35 = vpop.eup %1401  ;;  %v658_v31 = vmul.f32 %v1400_v15, %v1776_v25  ;;  %v646_v38 = vsel %vm645_vm15, %v1763_v3, %v644_v17 }
 0x259   :  { %v822_v21 = vrot.slane %v791_v12, 4  ;;  %v829_v30 = vmul.f32 %v791_v12, %v791_v12  ;;  %v653_v41 = vsel %vm652_vm2, %v1765_v4, %v651_v34  ;;  %v672_v42 = vmul.f32 %v1402_v35, %v1787_v43  ;;  %v1404_v44 = vpop.eup %1403 }
 0x25a   :  { %v1022_v9 = vrot.slane %v1020_v7, 4  ;;  %v660_v39 = vsel %vm659_vm3, %v1776_v25, %v658_v31  ;;  %v649_v47 = vsel %vm647_vm4, %v648_v37, %v646_v38  ;;  %v656_v51 = vsel %vm654_vm5, %v655_v45, %v653_v41  ;;  %v1406_v61 = vpop.eup %1405 }
 0x25b   :  { %v823_v32 = vadd.f32 %v822_v21, %v791_v12  ;;  %v831_v36 = vrot.slane %v829_v30, 4  ;;  %v674_v3 = vsel %vm673_vm6, %v1787_v43, %v672_v42  ;;  %v663_v6 = vsel %vm661_vm7, %v662_v50, %v660_v39  ;;  %v1408_v63 = vpop.eup %1407 }
 0x25c   :  { %v1023_v11 = vadd.f32 %v1022_v9, %v1020_v7  ;;  %v665_v54 = vmul.f32 %v1404_v44, %v1782_v10  ;;  %v676_v4 = vand.u32 2147483648, %v1787_v43  ;;  %v1152_v57 = vadd.f32 -1.0, %v649_v47 }
 0x25d   :  { %v824_v22 = vrot.slane %v823_v32, 2  ;;  %v832_v46 = vadd.f32 %v831_v36, %v829_v30  ;;  %v1153_v58 = vadd.f32 -1.0, %v656_v51  ;;  %v1154_v60 = vadd.f32 -1.0, %v663_v6 }
 0x25e   :  { %v1024_v14 = vrot.slane %v1023_v11, 2  ;;  %v677_v23 = vsel %vm675_vm8, %v676_v4, %v674_v3  ;;  %v667_v62 = vsel %vm666_vm0, %v1782_v10, %v665_v54  ;;  %v735_v7 = vand.u32 2147483647, %v1152_v57 }
 0x25f   :  { %v825_v52 = vadd.f32 %v824_v22, %v823_v32  ;;  %v833_v55 = vrot.slane %v832_v46, 2  ;;  %v736_v43 = vand.u32 2147483647, %v1153_v58  ;;  %v1874_v9 = vadd.f32 -1.0, %v677_v23 }
 0x260   :  { %v1025_v16 = vadd.f32 %v1024_v14, %v1023_v11  ;;  %v737_v14 = vand.u32 2147483647, %v1154_v60  ;;  %v707_v24 = vmul.f32 %v1406_v61, %v1839_v33  ;;  %v714_v48 = vmul.f32 %v1408_v63, %v1800_v27 }
 0x261   :  { %v826_v59 = vrot.slane %v825_v52, 1  ;;  %v1871_v0 = vadd.f32 %v833_v55, %v832_v46  ;;  %vm710_vm12 = vcmp.eq.f32.partialorder %v1839_v33, 0.0  ;;  %v711_v28 = vand.u32 2147483648, %v1839_v33 }
 0x262   :  { %v1026_v18 = vrot.slane %v1025_v16, 1  ;;  %vm715_vm13 = vcmp.eq.f32.partialorder %v1800_v27, inf  ;;  %v709_v32 = vsel %vm708_vm11, %v1839_v33, %v707_v24  ;;  %vm717_vm2 = vcmp.eq.f32.partialorder %v1800_v27, 0.0 }
 0x263   :  { %v827_v11 = vadd.f32 %v826_v59, %v825_v52  ;;  %v835_v26 = vrot.slane %v1871_v0, 1  ;;  %v716_v35 = vsel %vm715_vm13, %v1800_v27, %v714_v48  ;;  %v718_v22 = vand.u32 2147483648, %v1800_v27 }
 0x264   :  { %v1027_v19 = vadd.f32 %v1026_v18, %v1025_v16  ;;  %v670_v16 = vsel %vm668_vm1, %v669_v2, %v667_v62  ;;  %v712_v41 = vsel %vm710_vm12, %v711_v28, %v709_v32  ;;  %v739_v33 = vand.u32 2147483647, %v1874_v9 }
 0x265   :  { %v1155_v10 = vadd.f32 -1.0, %v670_v16  ;;  %v719_v46 = vsel %vm717_vm2, %v718_v22, %v716_v35  ;;  %v1161_v3 = vadd.f32 -1.0, %v712_v41  ;;  %v836_v58 = vadd.f32 %v835_v26, %v1871_v0 }
 0x266   :  { %v1821_v20 = vmul.f32 0.125, %v1027_v19  ;;  %v1162_v59 = vadd.f32 -1.0, %v719_v46 }
 0x267   :  { %v738_v38 = vand.u32 2147483647, %v1155_v10  ;;  %v744_v2 = vand.u32 2147483647, %v1161_v3  ;;  %v837_v22 = vmul.f32 0.125, %v836_v58 }
 0x268   :  { %1077 = vst [vmem:[%s1944_s3 + $0x7] sm:$0x1] %v1821_v20 }
 0x28f   :  { %v810_v40 = vpop.xlane.xlu0 %809 }
 0x290   :  { %1409 = vrsqrt.f32 %v810_v40  ;;  %vm813_vm9 = vcmp.eq.f32.partialorder %v810_v40, inf  ;;  %v816_v56 = vand.u32 2147483648, %v810_v40  ;;  %vm815_vm10 = vcmp.eq.f32.partialorder %v810_v40, 0.0 }
 0x293   :  { %v1859_v53 = vpop.xlane.xlu0 %615 }
 0x294   :  { %1411 = vrsqrt.f32 %v1859_v53  ;;  %vm687_vm14 = vcmp.eq.f32.partialorder %v1859_v53, inf  ;;  %v690_v34 = vand.u32 2147483648, %v1859_v53  ;;  %vm689_vm15 = vcmp.eq.f32.partialorder %v1859_v53, 0.0 }
 0x297   :  { %v1867_v25 = vpop.xlane.xlu0 %868 }
 0x298   :  { %1413 = vrsqrt.f32 %v1867_v25  ;;  %vm872_vm3 = vcmp.eq.f32.partialorder %v1867_v25, inf  ;;  %vm874_vm4 = vcmp.eq.f32.partialorder %v1867_v25, 0.0  ;;  %v875_v39 = vand.u32 2147483648, %v1867_v25 }
 0x29a   :  { %v1410_v5 = vpop.eup %1409 }
 0x29b   :  { %v812_v18 = vmul.f32 %v1410_v5, %v810_v40  ;;  %v1877_v19 = vpop.xlane.xlu0 %956 }
 0x29c   :  { %1415 = vrsqrt.f32 %v1877_v19  ;;  %vm960_vm5 = vcmp.eq.f32.partialorder %v1877_v19, inf  ;;  %vm962_vm6 = vcmp.eq.f32.partialorder %v1877_v19, 0.0 }
 0x29d   :  { %v814_v12 = vsel %vm813_vm9, %v810_v40, %v812_v18 }
 0x29e   :  { %v1412_v21 = vpop.eup %1411  ;;  %v817_v13 = vsel %vm815_vm10, %v816_v56, %v814_v12 }
 0x29f   :  { %v818_v30 = vadd.f32 %v817_v13, %v735_v7  ;;  %v686_v15 = vmul.f32 %v1412_v21, %v1859_v53  ;;  %v1888_v17 = vpop.xlane.xlu0 %1031 }
 0x2a0   :  { %1417 = vrsqrt.f32 %v1888_v17  ;;  %vm1035_vm7 = vcmp.eq.f32.partialorder %v1888_v17, inf  ;;  %vm1037_vm8 = vcmp.eq.f32.partialorder %v1888_v17, 0.0 }
 0x2a1   :  { %v819_v36 = vadd.f32 %v818_v30, %v736_v43  ;;  %v688_v31 = vsel %vm687_vm14, %v1859_v53, %v686_v15  ;;  %v828_v53 = vmul.f32 0.125, %v827_v11  ;;  %v745_v11 = vand.u32 2147483647, %v1162_v59 }
 0x2a2   :  { %v1414_v37 = vpop.eup %1413  ;;  %v691_v40 = vsel %vm689_vm15, %v690_v34, %v688_v31 }
 0x2a3   :  { %v820_v42 = vadd.f32 %v819_v36, %v737_v14  ;;  %v1158_v44 = vadd.f32 -1.0, %v691_v40  ;;  %v871_v45 = vmul.f32 %v1414_v37, %v1867_v25  ;;  %v855_v30 = vmul.f32 2.0, %v828_v53 }
 0x2a5   :  { %v839_v47 = vrot.slane %v820_v42, 4  ;;  %v846_v50 = vmul.f32 %v820_v42, %v820_v42  ;;  %v741_v51 = vand.u32 2147483647, %v1158_v44  ;;  %v873_v27 = vsel %vm872_vm3, %v1867_v25, %v871_v45 }
 0x2a6   :  { %v1416_v52 = vpop.eup %1415  ;;  %v876_v6 = vsel %vm874_vm4, %v875_v39, %v873_v27 }
 0x2a7   :  { %v840_v54 = vadd.f32 %v839_v47, %v820_v42  ;;  %v848_v55 = vrot.slane %v846_v50, 4  ;;  %v907_v4 = vadd.f32 %v1813_v49, %v741_v51  ;;  %v877_v57 = vadd.f32 %v876_v6, %v738_v38 }
 0x2a8   :  { %v959_v23 = vmul.f32 %v1416_v52, %v1877_v19  ;;  %v963_v49 = vand.u32 2147483648, %v1877_v19 }
 0x2a9   :  { %v841_v60 = vrot.slane %v840_v54, 2  ;;  %v849_v25 = vadd.f32 %v848_v55, %v846_v50  ;;  %v908_v61 = vmul.f32 %v907_v4, %v907_v4  ;;  %v878_v62 = vadd.f32 %v877_v57, %v739_v33 }
 0x2aa   :  { %v1418_v63 = vpop.eup %1417  ;;  %v961_v5 = vsel %vm960_vm5, %v1877_v19, %v959_v23  ;;  %v1038_v19 = vand.u32 2147483648, %v1888_v17 }
 0x2ab   :  { %v842_v7 = vadd.f32 %v841_v60, %v840_v54  ;;  %v850_v43 = vrot.slane %v849_v25, 2  ;;  %v910_v0 = vrot.slane %v908_v61, 4  ;;  %v879_v9 = vmul.f32 %v878_v62, %v878_v62 }
 0x2ac   :  { %v964_v14 = vsel %vm962_vm6, %v963_v49, %v961_v5  ;;  %v1034_v16 = vmul.f32 %v1418_v63, %v1888_v17 }
 0x2ad   :  { %v843_v18 = vrot.slane %v842_v7, 1  ;;  %v851_v24 = vadd.f32 %v850_v43, %v849_v25  ;;  %v911_v56 = vadd.f32 %v910_v0, %v908_v61  ;;  %v881_v26 = vrot.slane %v879_v9, 4 }
 0x2ae   :  { %v965_v48 = vadd.f32 %v964_v14, %v744_v2  ;;  %v1036_v12 = vsel %vm1035_vm7, %v1888_v17, %v1034_v16 }
 0x2af   :  { %v844_v21 = vadd.f32 %v843_v18, %v842_v7  ;;  %v852_v10 = vrot.slane %v851_v24, 1  ;;  %v912_v13 = vrot.slane %v911_v56, 2  ;;  %v882_v28 = vadd.f32 %v881_v26, %v879_v9 }
 0x2b0   :  { %v966_v15 = vadd.f32 %v965_v48, %v745_v11  ;;  %v1039_v32 = vsel %vm1037_vm8, %v1038_v19, %v1036_v12 }
 0x2b1   :  { %v845_v34 = vmul.f32 0.125, %v844_v21  ;;  %v853_v35 = vadd.f32 %v852_v10, %v851_v24  ;;  %v913_v36 = vadd.f32 %v912_v13, %v911_v56  ;;  %v883_v31 = vrot.slane %v882_v28, 2 }
 0x2b2   :  { %v967_v37 = vsub.f32 1.0, %v966_v15  ;;  %v1163_v38 = vadd.f32 -1.0, %v1039_v32 }
 0x2b3   :  { %v856_v40 = vmul.f32 %v855_v30, %v845_v34  ;;  %v914_v41 = vrot.slane %v913_v36, 1  ;;  %v884_v42 = vadd.f32 %v883_v31, %v882_v28  ;;  %v854_v17 = vmul.f32 0.125, %v853_v35 }
 0x2b4   :  { %v968_v44 = vmul.f32 %v967_v37, %v967_v37  ;;  %v1041_v45 = vmax.f32 %v1163_v38, 0.0 }
 0x2b5   :  { %v857_v46 = vadd.f32 %v856_v40, %v837_v22  ;;  %v915_v39 = vadd.f32 %v914_v41, %v913_v36  ;;  %v885_v47 = vrot.slane %v884_v42, 1 }
 0x2b6   :  { %v970_v50 = vrot.slane %v968_v44, 4  ;;  %v1043_v51 = vrot.slane %v1041_v45, 4 }
 0x2b7   :  { %v916_v27 = vmul.f32 0.125, %v915_v39  ;;  %v858_v52 = vadd.f32 %v857_v46, %v854_v17  ;;  %v886_v53 = vadd.f32 %v885_v47, %v884_v42 }
 0x2b8   :  { %v971_v33 = vadd.f32 %v970_v50, %v968_v44  ;;  %v1044_v3 = vadd.f32 %v1043_v51, %v1041_v45 }
 0x2b9   :  { %1069 = vst [vmem:[%s1944_s3 + $0x3] sm:$0x1] %v916_v27  ;;  %v1051_v6 = vadd.f32 %v858_v52, %v1793_v8  ;;  %1065 = vst [vmem:[%s1944_s3 + $0x1] sm:$0x1] %v858_v52  ;;  %v887_v54 = vmul.f32 0.125, %v886_v53 }
 0x2ba   :  { %v972_v55 = vrot.slane %v971_v33, 2  ;;  %v1045_v4 = vrot.slane %v1044_v3, 2 }
 0x2bb   :  { %v1052_v57 = vadd.f32 %v1051_v6, %v1807_v29  ;;  %1067 = vst [vmem:[%s1944_s3 + $0x2] sm:$0x1] %v887_v54 }
 0x2bc   :  { %v973_v58 = vadd.f32 %v972_v55, %v971_v33  ;;  %v1046_v59 = vadd.f32 %v1045_v4, %v1044_v3 }
 0x2bd   :  { %v1053_v23 = vadd.f32 %v1052_v57, %v887_v54 }
 0x2be   :  { %v974_v60 = vrot.slane %v973_v58, 1  ;;  %v1047_v25 = vrot.slane %v1046_v59, 1 }
 0x2bf   :  { %v1054_v61 = vadd.f32 %v1053_v23, %v916_v27 }
 0x2c0   :  { %v975_v8 = vadd.f32 %v974_v60, %v973_v58  ;;  %v1048_v62 = vadd.f32 %v1047_v25, %v1046_v59 }
 0x2c2   :  { %v976_v63 = vmul.f32 0.125, %v975_v8  ;;  %v1049_v2 = vmul.f32 0.125, %v1048_v62 }
 0x2c4   :  { %1073 = vst [vmem:[%s1944_s3 + $0x5] sm:$0x1] %v976_v63  ;;  %v1055_v5 = vadd.f32 %v1054_v61, %v976_v63  ;;  %v1050_v29 = vmul.f32 0.1, %v1049_v2 }
 0x2c6   :  { %v1057_v49 = vadd.f32 %v1055_v5, %v1815_v1  ;;  %1079 = vst [vmem:[%s1944_s3 + $0x8] sm:$0x1] %v1050_v29 }
 0x2c8   :  { %v1058_v7 = vadd.f32 %v1057_v49, %v1821_v20 }
 0x2ca   :  { %v1059_v43 = vadd.f32 %v1058_v7, %v1050_v29 }
 0x2cc   :  { %1082 = vst [vmem:[%s1944_s3 + $0xa] sm:$0x1] %v1059_v43 }

</bundles_post_ra>
